<compile_context>
chip_gen: v7x
topology: tpu7x:2x2x1
jax: 0.10.0
libtpu: 0.0.40
codegen_flags: <defaults>
</compile_context>

<pallas_src>
import jax
import jax.numpy as jnp
from jax import lax
from jax.experimental import pallas as pl
from jax.experimental.pallas import tpu as pltpu


# ----------------------------------------------------------------------------
# Fused MHA kernel — one grid step == a slice of the batch, all heads.
#   q_ref:(Bb,Tq,E)  k_ref/v_ref:(Bb,Tk,E)
#   wq/wk/wv:(H,E,hd) bf16 (scale folded into wq), bq/bk/bv:(H,1,hd) f32
#   wo:(H,hd,E) bf16, bo:(1,E) f32
#   y_ref:(Bb,Tq,E)   w_ref (optional): (Bb,Tq,H*Tk) f32
# ----------------------------------------------------------------------------
def _mha_fused_kernel(q_ref, k_ref, v_ref,
                      wq_ref, bq_ref, wk_ref, bk_ref, wv_ref, bv_ref,
                      wo_ref, bo_ref,
                      y_ref, w_ref=None):
    f32 = jnp.float32
    bf16 = jnp.bfloat16

    Bb, Tq, E = q_ref.shape
    Tk = k_ref.shape[1]
    H = wq_ref.shape[0]

    # Flatten batch into rows; single bf16 cast per activation tile.
    q = q_ref[...].reshape(Bb * Tq, E).astype(bf16)
    k = k_ref[...].reshape(Bb * Tk, E).astype(bf16)
    v = v_ref[...].reshape(Bb * Tk, E).astype(bf16)

    # Per-head projections.  Weights are pre-split to (H, E, hd) in the wrapper,
    # so there is no lane-granularity column slicing of a (T, C) slab in-kernel.
    # 1/sqrt(hd) is already folded into wq/bq.
    qh, kh, vh = [], [], []
    for h in range(H):
        qh.append((jnp.dot(q, wq_ref[h], preferred_element_type=f32)
                   + bq_ref[h]).astype(bf16))                       # (Bb*Tq, hd)
        kh.append((jnp.dot(k, wk_ref[h], preferred_element_type=f32)
                   + bk_ref[h]).astype(bf16))                       # (Bb*Tk, hd)
        vh.append((jnp.dot(v, wv_ref[h], preferred_element_type=f32)
                   + bv_ref[h]).astype(bf16))                       # (Bb*Tk, hd)

    contract_last = (((1,), (1,)), ((), ()))

    # TODO(synk): optional `mask` argument (masked_fill with -inf) not wired in;
    # this path corresponds to mask=None.

    for b in range(Bb):                    # static unroll, Bb is tiny
        rq = slice(b * Tq, (b + 1) * Tq)   # sublane-aligned row slices (Tq % 8 == 0)
        rk = slice(b * Tk, (b + 1) * Tk)
        acc = jnp.zeros((Tq, E), f32)      # head concat folded into out-proj accumulation
        slabs = []
        for h in range(H):                 # static unroll, H is small
            s = lax.dot_general(qh[h][rq], kh[h][rk], contract_last,
                                preferred_element_type=f32)          # (Tq, Tk) f32
            s = s - jnp.max(s, axis=-1, keepdims=True)
            e = jnp.exp(s)
            denom = jnp.sum(e, axis=-1, keepdims=True)
            if w_ref is not None:
                p = e / denom                                # exact: weights sum to 1
                slabs.append(p)
            else:
                p = e * pl.reciprocal(denom, approx=True)    # EUP slot, ~free
            ph = jnp.dot(p.astype(bf16), vh[h][rk],
                         preferred_element_type=f32)                 # (Tq, hd)
            acc = acc + jnp.dot(ph.astype(bf16), wo_ref[h],
                                preferred_element_type=f32)          # (Tq, E)
        y_ref[b] = (acc + bo_ref[...]).astype(y_ref.dtype)
        if w_ref is not None:
            # Single lane-dense (Tq, H*Tk) slab store per batch element.
            w_ref[b] = jnp.concatenate(slabs, axis=-1).astype(w_ref.dtype)


def _full_spec(shape):
    # Whole-array block, same block every grid step (fetched once, stays resident).
    # NOTE: could add pipeline_mode=pl.Buffered(1) to single-buffer these when E/C
    # grow on v7x; irrelevant at E=C=32.
    n = len(shape)
    return pl.BlockSpec(shape, lambda i, _n=n: (0,) * _n)


# ----------------------------------------------------------------------------
# Module wrapper
# ----------------------------------------------------------------------------
class MultiheadAttentionPallas:
    def __init__(self, n_embd, proj_size, num_heads, key):
        assert proj_size % num_heads == 0
        self.n_embd = n_embd
        self.proj_size = proj_size
        self.num_heads = num_heads
        hd = proj_size // num_heads
        scale = 1.0 / (hd ** 0.5)

        ks = jax.random.split(key, 8)
        s_in = 1.0 / (n_embd ** 0.5)
        s_pr = 1.0 / (proj_size ** 0.5)
        # nn.Linear-equivalent params, stored pre-transposed (in, out), kept in f32
        # for the pure-JAX reference.
        self.wq_t = jax.random.uniform(ks[0], (n_embd, proj_size), jnp.float32, -s_in, s_in)
        self.bq = jax.random.uniform(ks[1], (1, proj_size), jnp.float32, -s_in, s_in)
        self.wk_t = jax.random.uniform(ks[2], (n_embd, proj_size), jnp.float32, -s_in, s_in)
        self.bk = jax.random.uniform(ks[3], (1, proj_size), jnp.float32, -s_in, s_in)
        self.wv_t = jax.random.uniform(ks[4], (n_embd, proj_size), jnp.float32, -s_in, s_in)
        self.bv = jax.random.uniform(ks[5], (1, proj_size), jnp.float32, -s_in, s_in)
        self.wo_t = jax.random.uniform(ks[6], (proj_size, n_embd), jnp.float32, -s_pr, s_pr)
        self.bo = jax.random.uniform(ks[7], (1, n_embd), jnp.float32, -s_pr, s_pr)

        # Kernel layouts: per-head split, 1/sqrt(hd) folded into the q projection,
        # matmul weights in bf16, biases kept f32 (added to f32 accumulators).
        def split_w(w):   # (E, C) -> (H, E, hd)
            return w.reshape(n_embd, num_heads, hd).transpose(1, 0, 2)

        def split_b(b):   # (1, C) -> (H, 1, hd)
            return b.reshape(num_heads, hd)[:, None, :]

        self.wq_h = split_w(self.wq_t * scale).astype(jnp.bfloat16)
        self.bq_h = split_b(self.bq * scale)
        self.wk_h = split_w(self.wk_t).astype(jnp.bfloat16)
        self.bk_h = split_b(self.bk)
        self.wv_h = split_w(self.wv_t).astype(jnp.bfloat16)
        self.bv_h = split_b(self.bv)
        self.wo_h = self.wo_t.reshape(num_heads, hd, n_embd).astype(jnp.bfloat16)
        self.bo_h = self.bo

    def __call__(self, q, k, v, mask=None, need_weights=True):
        # q: (B, Tq, n_embd), k/v: (B, Tk, n_embd)
        if mask is not None:
            # TODO(synk): masked_fill(mask == 1, -inf) path not implemented.
            raise NotImplementedError("mask is not supported in this Pallas port")

        B, Tq, E = q.shape
        Tk = k.shape[1]
        H = self.num_heads
        assert E == self.n_embd

        # Grid capped at 2: bounded per-step overhead on 1-TC chips, and a 2-way
        # parallel axis so v7x's two TensorCores each take half the batch.
        nb = 2 if (B >= 2 and B % 2 == 0) else 1
        bb = B // nb

        weight_inputs = (self.wq_h, self.bq_h, self.wk_h, self.bk_h,
                         self.wv_h, self.bv_h, self.wo_h, self.bo_h)
        in_specs = [
            pl.BlockSpec((bb, Tq, E), lambda i: (i, 0, 0)),   # q
            pl.BlockSpec((bb, Tk, E), lambda i: (i, 0, 0)),   # k
            pl.BlockSpec((bb, Tk, E), lambda i: (i, 0, 0)),   # v
        ] + [_full_spec(w.shape) for w in weight_inputs]

        if need_weights:
            out_shape = (jax.ShapeDtypeStruct((B, Tq, E), q.dtype),
                         jax.ShapeDtypeStruct((B, Tq, H * Tk), jnp.float32))
            out_specs = (pl.BlockSpec((bb, Tq, E), lambda i: (i, 0, 0)),
                         pl.BlockSpec((bb, Tq, H * Tk), lambda i: (i, 0, 0)))
        else:
            out_shape = jax.ShapeDtypeStruct((B, Tq, E), q.dtype)
            out_specs = pl.BlockSpec((bb, Tq, E), lambda i: (i, 0, 0))

        result = pl.pallas_call(
            _mha_fused_kernel,
            out_shape=out_shape,
            grid=(nb,),
            in_specs=in_specs,
            out_specs=out_specs,
            compiler_params=pltpu.CompilerParams(
                dimension_semantics=("parallel",)),
        )(q, k, v, *weight_inputs)

        if need_weights:
            y, w_packed = result
            # Lane-dense kernel output -> (B, H, Tq, Tk); plain XLA layout plumbing.
            att_w = w_packed.reshape(B, Tq, H, Tk).transpose(0, 2, 1, 3)
            return y, att_w
        return result, None


# ----------------------------------------------------------------------------
# Pure-JAX reference (mirrors the kernel's bf16 matmul / f32 softmax numerics)
# ----------------------------------------------------------------------------
def reference(m, q, k, v):
    f32, bf16 = jnp.float32, jnp.bfloat16
    B, Tq, _ = q.shape
    Tk = k.shape[1]
    H, C = m.num_heads, m.proj_size
    hd = C // H
    scale = 1.0 / (hd ** 0.5)

    qb, kb, vb = q.astype(bf16), k.astype(bf16), v.astype(bf16)
    qp = jnp.dot(qb, (m.wq_t * scale).astype(bf16), preferred_element_type=f32) + m.bq * scale
    kp = jnp.dot(kb, m.wk_t.astype(bf16), preferred_element_type=f32) + m.bk
    vp = jnp.dot(vb, m.wv_t.astype(bf16), preferred_element_type=f32) + m.bv

    qh = qp.reshape(B, Tq, H, hd).transpose(0, 2, 1, 3).astype(bf16)
    kh = kp.reshape(B, Tk, H, hd).transpose(0, 2, 1, 3).astype(bf16)
    vh = vp.reshape(B, Tk, H, hd).transpose(0, 2, 1, 3).astype(bf16)

    att = jnp.einsum('bhqd,bhkd->bhqk', qh, kh, preferred_element_type=f32)
    w = jax.nn.softmax(att, axis=-1)
    yh = jnp.einsum('bhqk,bhkd->bhqd', w.astype(bf16), vh, preferred_element_type=f32)
    y = yh.transpose(0, 2, 1, 3).reshape(B, Tq, C).astype(bf16)
    y = jnp.dot(y, m.wo_t.astype(bf16), preferred_element_type=f32) + m.bo
    return y, w


if __name__ == "__main__":
    # config: n_embd=32, proj_size=32, num_heads=4; dropout rates irrelevant (eval)
    B, Tq, Tk, n_embd, proj_size, num_heads = 2, 8, 8, 32, 32, 4

    key = jax.random.PRNGKey(0)
    kq, kk, kv, kparams = jax.random.split(key, 4)
    q = jax.random.normal(kq, (B, Tq, n_embd), jnp.float32)
    k = jax.random.normal(kk, (B, Tk, n_embd), jnp.float32)
    v = jax.random.normal(kv, (B, Tk, n_embd), jnp.float32)

    module = MultiheadAttentionPallas(n_embd, proj_size, num_heads, kparams)

    y, att_w = module(q, k, v)
    y = jax.block_until_ready(y)
    att_w = jax.block_until_ready(att_w)

    # Weights-skipping fast path (approximate reciprocal in softmax denom).
    y_fast, _ = module(q, k, v, need_weights=False)
    y_fast = jax.block_until_ready(y_fast)

    y_ref, w_ref_ = reference(module, q, k, v)

    assert y.shape == (B, Tq, n_embd)
    assert att_w.shape == (B, num_heads, Tq, Tk)
    # Exact divide on the weights path: probabilities sum to 1.
    assert jnp.allclose(att_w.sum(-1), 1.0, atol=1e-5)
    # bf16 matmuls / f32 softmax in both kernel and reference.
    assert jnp.allclose(att_w, w_ref_, atol=1e-2, rtol=1e-2)
    assert jnp.allclose(y, y_ref, atol=1e-2, rtol=1e-2)
    # Fast path differs only by the approximate EUP reciprocal.
    assert jnp.allclose(y_fast, y, atol=5e-3, rtol=5e-3)

    print("KERNEL_OK")
</pallas_src>

<mosaic_0001>
module attributes {stable_mosaic.version = 11 : i64} {
  func.func @_mha_fused_kernel(%arg0: i32, %arg1: memref<1x8x32xf32, #tpu.memory_space<vmem>>, %arg2: memref<1x8x32xf32, #tpu.memory_space<vmem>>, %arg3: memref<1x8x32xf32, #tpu.memory_space<vmem>>, %arg4: memref<4x32x8xbf16, #tpu.memory_space<vmem>>, %arg5: memref<4x1x8xf32, #tpu.memory_space<vmem>>, %arg6: memref<4x32x8xbf16, #tpu.memory_space<vmem>>, %arg7: memref<4x1x8xf32, #tpu.memory_space<vmem>>, %arg8: memref<4x32x8xbf16, #tpu.memory_space<vmem>>, %arg9: memref<4x1x8xf32, #tpu.memory_space<vmem>>, %arg10: memref<4x8x32xbf16, #tpu.memory_space<vmem>>, %arg11: memref<1x32xf32, #tpu.memory_space<vmem>>, %arg12: memref<1x8x32xf32, #tpu.memory_space<vmem>>, %arg13: memref<1x8x32xf32, #tpu.memory_space<vmem>>) attributes {dimension_semantics = [#tpu.dimension_semantics<parallel>], iteration_bounds = array<i64: 2>, scalar_prefetch = 0 : i64, scratch_operands = 0 : i64, tpu.core_type = #tpu.core_type<tc>, window_params = [{transform_indices = @transform_0, window_bounds = array<i64: 1, 8, 32>}, {transform_indices = @transform_1, window_bounds = array<i64: 1, 8, 32>}, {transform_indices = @transform_2, window_bounds = array<i64: 1, 8, 32>}, {pipeline_mode = #tpu.pipeline_mode<synchronous>, transform_indices = @transform_3, window_bounds = array<i64: 4, 32, 8>}, {pipeline_mode = #tpu.pipeline_mode<synchronous>, transform_indices = @transform_4, window_bounds = array<i64: 4, 1, 8>}, {pipeline_mode = #tpu.pipeline_mode<synchronous>, transform_indices = @transform_5, window_bounds = array<i64: 4, 32, 8>}, {pipeline_mode = #tpu.pipeline_mode<synchronous>, transform_indices = @transform_6, window_bounds = array<i64: 4, 1, 8>}, {pipeline_mode = #tpu.pipeline_mode<synchronous>, transform_indices = @transform_7, window_bounds = array<i64: 4, 32, 8>}, {pipeline_mode = #tpu.pipeline_mode<synchronous>, transform_indices = @transform_8, window_bounds = array<i64: 4, 1, 8>}, {pipeline_mode = #tpu.pipeline_mode<synchronous>, transform_indices = @transform_9, window_bounds = array<i64: 4, 8, 32>}, {pipeline_mode = #tpu.pipeline_mode<synchronous>, transform_indices = @transform_10, window_bounds = array<i64: 1, 32>}, {transform_indices = @transform_11, window_bounds = array<i64: 1, 8, 32>}, {transform_indices = @transform_12, window_bounds = array<i64: 1, 8, 32>}]} {
    %c0 = arith.constant 0 : index
    %c0_0 = arith.constant 0 : index
    %c0_1 = arith.constant 0 : index
    %0 = vector.load %arg1[%c0, %c0_0, %c0_1] : memref<1x8x32xf32, #tpu.memory_space<vmem>>, vector<1x8x32xf32>
    %1 = vector.shape_cast %0 : vector<1x8x32xf32> to vector<8x32xf32>
    %2 = arith.truncf %1 : vector<8x32xf32> to vector<8x32xbf16>
    %c0_2 = arith.constant 0 : index
    %c0_3 = arith.constant 0 : index
    %c0_4 = arith.constant 0 : index
    %3 = vector.load %arg2[%c0_2, %c0_3, %c0_4] : memref<1x8x32xf32, #tpu.memory_space<vmem>>, vector<1x8x32xf32>
    %4 = vector.shape_cast %3 : vector<1x8x32xf32> to vector<8x32xf32>
    %5 = arith.truncf %4 : vector<8x32xf32> to vector<8x32xbf16>
    %c0_5 = arith.constant 0 : index
    %c0_6 = arith.constant 0 : index
    %c0_7 = arith.constant 0 : index
    %6 = vector.load %arg3[%c0_5, %c0_6, %c0_7] : memref<1x8x32xf32, #tpu.memory_space<vmem>>, vector<1x8x32xf32>
    %7 = vector.shape_cast %6 : vector<1x8x32xf32> to vector<8x32xf32>
    %8 = arith.truncf %7 : vector<8x32xf32> to vector<8x32xbf16>
    %c0_8 = arith.constant 0 : index
    %c0_9 = arith.constant 0 : index
    %c0_10 = arith.constant 0 : index
    %9 = vector.load %arg4[%c0_8, %c0_9, %c0_10] : memref<4x32x8xbf16, #tpu.memory_space<vmem>>, vector<1x32x8xbf16>
    %10 = vector.shape_cast %9 : vector<1x32x8xbf16> to vector<32x8xbf16>
    %cst = arith.constant dense<0.000000e+00> : vector<8x8xf32>
    %11 = tpu.matmul %2, %10, %cst {dimension_numbers = #tpu.dot_dimension_numbers<[1], [0], [0], [1], [0, 0, 1, 1], [], []>} : vector<8x32xbf16>, vector<32x8xbf16>, vector<8x8xf32> -> vector<8x8xf32>
    %c0_11 = arith.constant 0 : index
    %c0_12 = arith.constant 0 : index
    %c0_13 = arith.constant 0 : index
    %12 = vector.load %arg5[%c0_11, %c0_12, %c0_13] : memref<4x1x8xf32, #tpu.memory_space<vmem>>, vector<1x1x8xf32>
    %13 = vector.shape_cast %12 : vector<1x1x8xf32> to vector<1x8xf32>
    %14 = vector.broadcast %13 : vector<1x8xf32> to vector<8x8xf32>
    %15 = arith.addf %11, %14 : vector<8x8xf32>
    %16 = arith.truncf %15 : vector<8x8xf32> to vector<8x8xbf16>
    %c0_14 = arith.constant 0 : index
    %c0_15 = arith.constant 0 : index
    %c0_16 = arith.constant 0 : index
    %17 = vector.load %arg6[%c0_14, %c0_15, %c0_16] : memref<4x32x8xbf16, #tpu.memory_space<vmem>>, vector<1x32x8xbf16>
    %18 = vector.shape_cast %17 : vector<1x32x8xbf16> to vector<32x8xbf16>
    %cst_17 = arith.constant dense<0.000000e+00> : vector<8x8xf32>
    %19 = tpu.matmul %5, %18, %cst_17 {dimension_numbers = #tpu.dot_dimension_numbers<[1], [0], [0], [1], [0, 0, 1, 1], [], []>} : vector<8x32xbf16>, vector<32x8xbf16>, vector<8x8xf32> -> vector<8x8xf32>
    %c0_18 = arith.constant 0 : index
    %c0_19 = arith.constant 0 : index
    %c0_20 = arith.constant 0 : index
    %20 = vector.load %arg7[%c0_18, %c0_19, %c0_20] : memref<4x1x8xf32, #tpu.memory_space<vmem>>, vector<1x1x8xf32>
    %21 = vector.shape_cast %20 : vector<1x1x8xf32> to vector<1x8xf32>
    %22 = vector.broadcast %21 : vector<1x8xf32> to vector<8x8xf32>
    %23 = arith.addf %19, %22 : vector<8x8xf32>
    %24 = arith.truncf %23 : vector<8x8xf32> to vector<8x8xbf16>
    %c0_21 = arith.constant 0 : index
    %c0_22 = arith.constant 0 : index
    %c0_23 = arith.constant 0 : index
    %25 = vector.load %arg8[%c0_21, %c0_22, %c0_23] : memref<4x32x8xbf16, #tpu.memory_space<vmem>>, vector<1x32x8xbf16>
    %26 = vector.shape_cast %25 : vector<1x32x8xbf16> to vector<32x8xbf16>
    %cst_24 = arith.constant dense<0.000000e+00> : vector<8x8xf32>
    %27 = tpu.matmul %8, %26, %cst_24 {dimension_numbers = #tpu.dot_dimension_numbers<[1], [0], [0], [1], [0, 0, 1, 1], [], []>} : vector<8x32xbf16>, vector<32x8xbf16>, vector<8x8xf32> -> vector<8x8xf32>
    %c0_25 = arith.constant 0 : index
    %c0_26 = arith.constant 0 : index
    %c0_27 = arith.constant 0 : index
    %28 = vector.load %arg9[%c0_25, %c0_26, %c0_27] : memref<4x1x8xf32, #tpu.memory_space<vmem>>, vector<1x1x8xf32>
    %29 = vector.shape_cast %28 : vector<1x1x8xf32> to vector<1x8xf32>
    %30 = vector.broadcast %29 : vector<1x8xf32> to vector<8x8xf32>
    %31 = arith.addf %27, %30 : vector<8x8xf32>
    %32 = arith.truncf %31 : vector<8x8xf32> to vector<8x8xbf16>
    %c1 = arith.constant 1 : index
    %c0_28 = arith.constant 0 : index
    %c0_29 = arith.constant 0 : index
    %33 = vector.load %arg4[%c1, %c0_28, %c0_29] : memref<4x32x8xbf16, #tpu.memory_space<vmem>>, vector<1x32x8xbf16>
    %34 = vector.shape_cast %33 : vector<1x32x8xbf16> to vector<32x8xbf16>
    %cst_30 = arith.constant dense<0.000000e+00> : vector<8x8xf32>
    %35 = tpu.matmul %2, %34, %cst_30 {dimension_numbers = #tpu.dot_dimension_numbers<[1], [0], [0], [1], [0, 0, 1, 1], [], []>} : vector<8x32xbf16>, vector<32x8xbf16>, vector<8x8xf32> -> vector<8x8xf32>
    %c1_31 = arith.constant 1 : index
    %c0_32 = arith.constant 0 : index
    %c0_33 = arith.constant 0 : index
    %36 = vector.load %arg5[%c1_31, %c0_32, %c0_33] : memref<4x1x8xf32, #tpu.memory_space<vmem>>, vector<1x1x8xf32>
    %37 = vector.shape_cast %36 : vector<1x1x8xf32> to vector<1x8xf32>
    %38 = vector.broadcast %37 : vector<1x8xf32> to vector<8x8xf32>
    %39 = arith.addf %35, %38 : vector<8x8xf32>
    %40 = arith.truncf %39 : vector<8x8xf32> to vector<8x8xbf16>
    %c1_34 = arith.constant 1 : index
    %c0_35 = arith.constant 0 : index
    %c0_36 = arith.constant 0 : index
    %41 = vector.load %arg6[%c1_34, %c0_35, %c0_36] : memref<4x32x8xbf16, #tpu.memory_space<vmem>>, vector<1x32x8xbf16>
    %42 = vector.shape_cast %41 : vector<1x32x8xbf16> to vector<32x8xbf16>
    %cst_37 = arith.constant dense<0.000000e+00> : vector<8x8xf32>
    %43 = tpu.matmul %5, %42, %cst_37 {dimension_numbers = #tpu.dot_dimension_numbers<[1], [0], [0], [1], [0, 0, 1, 1], [], []>} : vector<8x32xbf16>, vector<32x8xbf16>, vector<8x8xf32> -> vector<8x8xf32>
    %c1_38 = arith.constant 1 : index
    %c0_39 = arith.constant 0 : index
    %c0_40 = arith.constant 0 : index
    %44 = vector.load %arg7[%c1_38, %c0_39, %c0_40] : memref<4x1x8xf32, #tpu.memory_space<vmem>>, vector<1x1x8xf32>
    %45 = vector.shape_cast %44 : vector<1x1x8xf32> to vector<1x8xf32>
    %46 = vector.broadcast %45 : vector<1x8xf32> to vector<8x8xf32>
    %47 = arith.addf %43, %46 : vector<8x8xf32>
    %48 = arith.truncf %47 : vector<8x8xf32> to vector<8x8xbf16>
    %c1_41 = arith.constant 1 : index
    %c0_42 = arith.constant 0 : index
    %c0_43 = arith.constant 0 : index
    %49 = vector.load %arg8[%c1_41, %c0_42, %c0_43] : memref<4x32x8xbf16, #tpu.memory_space<vmem>>, vector<1x32x8xbf16>
    %50 = vector.shape_cast %49 : vector<1x32x8xbf16> to vector<32x8xbf16>
    %cst_44 = arith.constant dense<0.000000e+00> : vector<8x8xf32>
    %51 = tpu.matmul %8, %50, %cst_44 {dimension_numbers = #tpu.dot_dimension_numbers<[1], [0], [0], [1], [0, 0, 1, 1], [], []>} : vector<8x32xbf16>, vector<32x8xbf16>, vector<8x8xf32> -> vector<8x8xf32>
    %c1_45 = arith.constant 1 : index
    %c0_46 = arith.constant 0 : index
    %c0_47 = arith.constant 0 : index
    %52 = vector.load %arg9[%c1_45, %c0_46, %c0_47] : memref<4x1x8xf32, #tpu.memory_space<vmem>>, vector<1x1x8xf32>
    %53 = vector.shape_cast %52 : vector<1x1x8xf32> to vector<1x8xf32>
    %54 = vector.broadcast %53 : vector<1x8xf32> to vector<8x8xf32>
    %55 = arith.addf %51, %54 : vector<8x8xf32>
    %56 = arith.truncf %55 : vector<8x8xf32> to vector<8x8xbf16>
    %c2 = arith.constant 2 : index
    %c0_48 = arith.constant 0 : index
    %c0_49 = arith.constant 0 : index
    %57 = vector.load %arg4[%c2, %c0_48, %c0_49] : memref<4x32x8xbf16, #tpu.memory_space<vmem>>, vector<1x32x8xbf16>
    %58 = vector.shape_cast %57 : vector<1x32x8xbf16> to vector<32x8xbf16>
    %cst_50 = arith.constant dense<0.000000e+00> : vector<8x8xf32>
    %59 = tpu.matmul %2, %58, %cst_50 {dimension_numbers = #tpu.dot_dimension_numbers<[1], [0], [0], [1], [0, 0, 1, 1], [], []>} : vector<8x32xbf16>, vector<32x8xbf16>, vector<8x8xf32> -> vector<8x8xf32>
    %c2_51 = arith.constant 2 : index
    %c0_52 = arith.constant 0 : index
    %c0_53 = arith.constant 0 : index
    %60 = vector.load %arg5[%c2_51, %c0_52, %c0_53] : memref<4x1x8xf32, #tpu.memory_space<vmem>>, vector<1x1x8xf32>
    %61 = vector.shape_cast %60 : vector<1x1x8xf32> to vector<1x8xf32>
    %62 = vector.broadcast %61 : vector<1x8xf32> to vector<8x8xf32>
    %63 = arith.addf %59, %62 : vector<8x8xf32>
    %64 = arith.truncf %63 : vector<8x8xf32> to vector<8x8xbf16>
    %c2_54 = arith.constant 2 : index
    %c0_55 = arith.constant 0 : index
    %c0_56 = arith.constant 0 : index
    %65 = vector.load %arg6[%c2_54, %c0_55, %c0_56] : memref<4x32x8xbf16, #tpu.memory_space<vmem>>, vector<1x32x8xbf16>
    %66 = vector.shape_cast %65 : vector<1x32x8xbf16> to vector<32x8xbf16>
    %cst_57 = arith.constant dense<0.000000e+00> : vector<8x8xf32>
    %67 = tpu.matmul %5, %66, %cst_57 {dimension_numbers = #tpu.dot_dimension_numbers<[1], [0], [0], [1], [0, 0, 1, 1], [], []>} : vector<8x32xbf16>, vector<32x8xbf16>, vector<8x8xf32> -> vector<8x8xf32>
    %c2_58 = arith.constant 2 : index
    %c0_59 = arith.constant 0 : index
    %c0_60 = arith.constant 0 : index
    %68 = vector.load %arg7[%c2_58, %c0_59, %c0_60] : memref<4x1x8xf32, #tpu.memory_space<vmem>>, vector<1x1x8xf32>
    %69 = vector.shape_cast %68 : vector<1x1x8xf32> to vector<1x8xf32>
    %70 = vector.broadcast %69 : vector<1x8xf32> to vector<8x8xf32>
    %71 = arith.addf %67, %70 : vector<8x8xf32>
    %72 = arith.truncf %71 : vector<8x8xf32> to vector<8x8xbf16>
    %c2_61 = arith.constant 2 : index
    %c0_62 = arith.constant 0 : index
    %c0_63 = arith.constant 0 : index
    %73 = vector.load %arg8[%c2_61, %c0_62, %c0_63] : memref<4x32x8xbf16, #tpu.memory_space<vmem>>, vector<1x32x8xbf16>
    %74 = vector.shape_cast %73 : vector<1x32x8xbf16> to vector<32x8xbf16>
    %cst_64 = arith.constant dense<0.000000e+00> : vector<8x8xf32>
    %75 = tpu.matmul %8, %74, %cst_64 {dimension_numbers = #tpu.dot_dimension_numbers<[1], [0], [0], [1], [0, 0, 1, 1], [], []>} : vector<8x32xbf16>, vector<32x8xbf16>, vector<8x8xf32> -> vector<8x8xf32>
    %c2_65 = arith.constant 2 : index
    %c0_66 = arith.constant 0 : index
    %c0_67 = arith.constant 0 : index
    %76 = vector.load %arg9[%c2_65, %c0_66, %c0_67] : memref<4x1x8xf32, #tpu.memory_space<vmem>>, vector<1x1x8xf32>
    %77 = vector.shape_cast %76 : vector<1x1x8xf32> to vector<1x8xf32>
    %78 = vector.broadcast %77 : vector<1x8xf32> to vector<8x8xf32>
    %79 = arith.addf %75, %78 : vector<8x8xf32>
    %80 = arith.truncf %79 : vector<8x8xf32> to vector<8x8xbf16>
    %c3 = arith.constant 3 : index
    %c0_68 = arith.constant 0 : index
    %c0_69 = arith.constant 0 : index
    %81 = vector.load %arg4[%c3, %c0_68, %c0_69] : memref<4x32x8xbf16, #tpu.memory_space<vmem>>, vector<1x32x8xbf16>
    %82 = vector.shape_cast %81 : vector<1x32x8xbf16> to vector<32x8xbf16>
    %cst_70 = arith.constant dense<0.000000e+00> : vector<8x8xf32>
    %83 = tpu.matmul %2, %82, %cst_70 {dimension_numbers = #tpu.dot_dimension_numbers<[1], [0], [0], [1], [0, 0, 1, 1], [], []>} : vector<8x32xbf16>, vector<32x8xbf16>, vector<8x8xf32> -> vector<8x8xf32>
    %c3_71 = arith.constant 3 : index
    %c0_72 = arith.constant 0 : index
    %c0_73 = arith.constant 0 : index
    %84 = vector.load %arg5[%c3_71, %c0_72, %c0_73] : memref<4x1x8xf32, #tpu.memory_space<vmem>>, vector<1x1x8xf32>
    %85 = vector.shape_cast %84 : vector<1x1x8xf32> to vector<1x8xf32>
    %86 = vector.broadcast %85 : vector<1x8xf32> to vector<8x8xf32>
    %87 = arith.addf %83, %86 : vector<8x8xf32>
    %88 = arith.truncf %87 : vector<8x8xf32> to vector<8x8xbf16>
    %c3_74 = arith.constant 3 : index
    %c0_75 = arith.constant 0 : index
    %c0_76 = arith.constant 0 : index
    %89 = vector.load %arg6[%c3_74, %c0_75, %c0_76] : memref<4x32x8xbf16, #tpu.memory_space<vmem>>, vector<1x32x8xbf16>
    %90 = vector.shape_cast %89 : vector<1x32x8xbf16> to vector<32x8xbf16>
    %cst_77 = arith.constant dense<0.000000e+00> : vector<8x8xf32>
    %91 = tpu.matmul %5, %90, %cst_77 {dimension_numbers = #tpu.dot_dimension_numbers<[1], [0], [0], [1], [0, 0, 1, 1], [], []>} : vector<8x32xbf16>, vector<32x8xbf16>, vector<8x8xf32> -> vector<8x8xf32>
    %c3_78 = arith.constant 3 : index
    %c0_79 = arith.constant 0 : index
    %c0_80 = arith.constant 0 : index
    %92 = vector.load %arg7[%c3_78, %c0_79, %c0_80] : memref<4x1x8xf32, #tpu.memory_space<vmem>>, vector<1x1x8xf32>
    %93 = vector.shape_cast %92 : vector<1x1x8xf32> to vector<1x8xf32>
    %94 = vector.broadcast %93 : vector<1x8xf32> to vector<8x8xf32>
    %95 = arith.addf %91, %94 : vector<8x8xf32>
    %96 = arith.truncf %95 : vector<8x8xf32> to vector<8x8xbf16>
    %c3_81 = arith.constant 3 : index
    %c0_82 = arith.constant 0 : index
    %c0_83 = arith.constant 0 : index
    %97 = vector.load %arg8[%c3_81, %c0_82, %c0_83] : memref<4x32x8xbf16, #tpu.memory_space<vmem>>, vector<1x32x8xbf16>
    %98 = vector.shape_cast %97 : vector<1x32x8xbf16> to vector<32x8xbf16>
    %cst_84 = arith.constant dense<0.000000e+00> : vector<8x8xf32>
    %99 = tpu.matmul %8, %98, %cst_84 {dimension_numbers = #tpu.dot_dimension_numbers<[1], [0], [0], [1], [0, 0, 1, 1], [], []>} : vector<8x32xbf16>, vector<32x8xbf16>, vector<8x8xf32> -> vector<8x8xf32>
    %c3_85 = arith.constant 3 : index
    %c0_86 = arith.constant 0 : index
    %c0_87 = arith.constant 0 : index
    %100 = vector.load %arg9[%c3_85, %c0_86, %c0_87] : memref<4x1x8xf32, #tpu.memory_space<vmem>>, vector<1x1x8xf32>
    %101 = vector.shape_cast %100 : vector<1x1x8xf32> to vector<1x8xf32>
    %102 = vector.broadcast %101 : vector<1x8xf32> to vector<8x8xf32>
    %103 = arith.addf %99, %102 : vector<8x8xf32>
    %104 = arith.truncf %103 : vector<8x8xf32> to vector<8x8xbf16>
    %cst_88 = arith.constant 0.000000e+00 : f32
    %105 = vector.broadcast %cst_88 : f32 to vector<8x32xf32>
    %cst_89 = arith.constant dense<0.000000e+00> : vector<8x8xf32>
    %106 = tpu.matmul %16, %24, %cst_89 {dimension_numbers = #tpu.dot_dimension_numbers<[1], [1], [0], [0], [0, 0, 1, 0], [], []>} : vector<8x8xbf16>, vector<8x8xbf16>, vector<8x8xf32> -> vector<8x8xf32>
    %cst_90 = arith.constant dense<0xFF800000> : vector<8xf32>
    %107 = vector.multi_reduction <maximumf>, %106, %cst_90 [1] : vector<8x8xf32> to vector<8xf32>
    %108 = vector.shape_cast %107 : vector<8xf32> to vector<8x1xf32>
    %109 = vector.broadcast %108 : vector<8x1xf32> to vector<8x8xf32>
    %110 = arith.subf %106, %109 : vector<8x8xf32>
    %111 = math.exp %110 : vector<8x8xf32>
    %cst_91 = arith.constant dense<0.000000e+00> : vector<8xf32>
    %112 = vector.multi_reduction <add>, %111, %cst_91 [1] : vector<8x8xf32> to vector<8xf32>
    %113 = vector.shape_cast %112 : vector<8xf32> to vector<8x1xf32>
    %114 = vector.broadcast %113 : vector<8x1xf32> to vector<8x8xf32>
    %115 = arith.divf %111, %114 : vector<8x8xf32>
    %116 = arith.truncf %115 : vector<8x8xf32> to vector<8x8xbf16>
    %cst_92 = arith.constant dense<0.000000e+00> : vector<8x8xf32>
    %117 = tpu.matmul %116, %32, %cst_92 {dimension_numbers = #tpu.dot_dimension_numbers<[1], [0], [0], [1], [0, 0, 1, 1], [], []>} : vector<8x8xbf16>, vector<8x8xbf16>, vector<8x8xf32> -> vector<8x8xf32>
    %118 = arith.truncf %117 : vector<8x8xf32> to vector<8x8xbf16>
    %c0_93 = arith.constant 0 : index
    %c0_94 = arith.constant 0 : index
    %c0_95 = arith.constant 0 : index
    %119 = vector.load %arg10[%c0_93, %c0_94, %c0_95] : memref<4x8x32xbf16, #tpu.memory_space<vmem>>, vector<1x8x32xbf16>
    %120 = vector.shape_cast %119 : vector<1x8x32xbf16> to vector<8x32xbf16>
    %cst_96 = arith.constant dense<0.000000e+00> : vector<8x32xf32>
    %121 = tpu.matmul %118, %120, %cst_96 {dimension_numbers = #tpu.dot_dimension_numbers<[1], [0], [0], [1], [0, 0, 1, 1], [], []>} : vector<8x8xbf16>, vector<8x32xbf16>, vector<8x32xf32> -> vector<8x32xf32>
    %122 = arith.addf %105, %121 : vector<8x32xf32>
    %cst_97 = arith.constant dense<0.000000e+00> : vector<8x8xf32>
    %123 = tpu.matmul %40, %48, %cst_97 {dimension_numbers = #tpu.dot_dimension_numbers<[1], [1], [0], [0], [0, 0, 1, 0], [], []>} : vector<8x8xbf16>, vector<8x8xbf16>, vector<8x8xf32> -> vector<8x8xf32>
    %cst_98 = arith.constant dense<0xFF800000> : vector<8xf32>
    %124 = vector.multi_reduction <maximumf>, %123, %cst_98 [1] : vector<8x8xf32> to vector<8xf32>
    %125 = vector.shape_cast %124 : vector<8xf32> to vector<8x1xf32>
    %126 = vector.broadcast %125 : vector<8x1xf32> to vector<8x8xf32>
    %127 = arith.subf %123, %126 : vector<8x8xf32>
    %128 = math.exp %127 : vector<8x8xf32>
    %cst_99 = arith.constant dense<0.000000e+00> : vector<8xf32>
    %129 = vector.multi_reduction <add>, %128, %cst_99 [1] : vector<8x8xf32> to vector<8xf32>
    %130 = vector.shape_cast %129 : vector<8xf32> to vector<8x1xf32>
    %131 = vector.broadcast %130 : vector<8x1xf32> to vector<8x8xf32>
    %132 = arith.divf %128, %131 : vector<8x8xf32>
    %133 = arith.truncf %132 : vector<8x8xf32> to vector<8x8xbf16>
    %cst_100 = arith.constant dense<0.000000e+00> : vector<8x8xf32>
    %134 = tpu.matmul %133, %56, %cst_100 {dimension_numbers = #tpu.dot_dimension_numbers<[1], [0], [0], [1], [0, 0, 1, 1], [], []>} : vector<8x8xbf16>, vector<8x8xbf16>, vector<8x8xf32> -> vector<8x8xf32>
    %135 = arith.truncf %134 : vector<8x8xf32> to vector<8x8xbf16>
    %c1_101 = arith.constant 1 : index
    %c0_102 = arith.constant 0 : index
    %c0_103 = arith.constant 0 : index
    %136 = vector.load %arg10[%c1_101, %c0_102, %c0_103] : memref<4x8x32xbf16, #tpu.memory_space<vmem>>, vector<1x8x32xbf16>
    %137 = vector.shape_cast %136 : vector<1x8x32xbf16> to vector<8x32xbf16>
    %cst_104 = arith.constant dense<0.000000e+00> : vector<8x32xf32>
    %138 = tpu.matmul %135, %137, %cst_104 {dimension_numbers = #tpu.dot_dimension_numbers<[1], [0], [0], [1], [0, 0, 1, 1], [], []>} : vector<8x8xbf16>, vector<8x32xbf16>, vector<8x32xf32> -> vector<8x32xf32>
    %139 = arith.addf %122, %138 : vector<8x32xf32>
    %cst_105 = arith.constant dense<0.000000e+00> : vector<8x8xf32>
    %140 = tpu.matmul %64, %72, %cst_105 {dimension_numbers = #tpu.dot_dimension_numbers<[1], [1], [0], [0], [0, 0, 1, 0], [], []>} : vector<8x8xbf16>, vector<8x8xbf16>, vector<8x8xf32> -> vector<8x8xf32>
    %cst_106 = arith.constant dense<0xFF800000> : vector<8xf32>
    %141 = vector.multi_reduction <maximumf>, %140, %cst_106 [1] : vector<8x8xf32> to vector<8xf32>
    %142 = vector.shape_cast %141 : vector<8xf32> to vector<8x1xf32>
    %143 = vector.broadcast %142 : vector<8x1xf32> to vector<8x8xf32>
    %144 = arith.subf %140, %143 : vector<8x8xf32>
    %145 = math.exp %144 : vector<8x8xf32>
    %cst_107 = arith.constant dense<0.000000e+00> : vector<8xf32>
    %146 = vector.multi_reduction <add>, %145, %cst_107 [1] : vector<8x8xf32> to vector<8xf32>
    %147 = vector.shape_cast %146 : vector<8xf32> to vector<8x1xf32>
    %148 = vector.broadcast %147 : vector<8x1xf32> to vector<8x8xf32>
    %149 = arith.divf %145, %148 : vector<8x8xf32>
    %150 = arith.truncf %149 : vector<8x8xf32> to vector<8x8xbf16>
    %cst_108 = arith.constant dense<0.000000e+00> : vector<8x8xf32>
    %151 = tpu.matmul %150, %80, %cst_108 {dimension_numbers = #tpu.dot_dimension_numbers<[1], [0], [0], [1], [0, 0, 1, 1], [], []>} : vector<8x8xbf16>, vector<8x8xbf16>, vector<8x8xf32> -> vector<8x8xf32>
    %152 = arith.truncf %151 : vector<8x8xf32> to vector<8x8xbf16>
    %c2_109 = arith.constant 2 : index
    %c0_110 = arith.constant 0 : index
    %c0_111 = arith.constant 0 : index
    %153 = vector.load %arg10[%c2_109, %c0_110, %c0_111] : memref<4x8x32xbf16, #tpu.memory_space<vmem>>, vector<1x8x32xbf16>
    %154 = vector.shape_cast %153 : vector<1x8x32xbf16> to vector<8x32xbf16>
    %cst_112 = arith.constant dense<0.000000e+00> : vector<8x32xf32>
    %155 = tpu.matmul %152, %154, %cst_112 {dimension_numbers = #tpu.dot_dimension_numbers<[1], [0], [0], [1], [0, 0, 1, 1], [], []>} : vector<8x8xbf16>, vector<8x32xbf16>, vector<8x32xf32> -> vector<8x32xf32>
    %156 = arith.addf %139, %155 : vector<8x32xf32>
    %cst_113 = arith.constant dense<0.000000e+00> : vector<8x8xf32>
    %157 = tpu.matmul %88, %96, %cst_113 {dimension_numbers = #tpu.dot_dimension_numbers<[1], [1], [0], [0], [0, 0, 1, 0], [], []>} : vector<8x8xbf16>, vector<8x8xbf16>, vector<8x8xf32> -> vector<8x8xf32>
    %cst_114 = arith.constant dense<0xFF800000> : vector<8xf32>
    %158 = vector.multi_reduction <maximumf>, %157, %cst_114 [1] : vector<8x8xf32> to vector<8xf32>
    %159 = vector.shape_cast %158 : vector<8xf32> to vector<8x1xf32>
    %160 = vector.broadcast %159 : vector<8x1xf32> to vector<8x8xf32>
    %161 = arith.subf %157, %160 : vector<8x8xf32>
    %162 = math.exp %161 : vector<8x8xf32>
    %cst_115 = arith.constant dense<0.000000e+00> : vector<8xf32>
    %163 = vector.multi_reduction <add>, %162, %cst_115 [1] : vector<8x8xf32> to vector<8xf32>
    %164 = vector.shape_cast %163 : vector<8xf32> to vector<8x1xf32>
    %165 = vector.broadcast %164 : vector<8x1xf32> to vector<8x8xf32>
    %166 = arith.divf %162, %165 : vector<8x8xf32>
    %167 = arith.truncf %166 : vector<8x8xf32> to vector<8x8xbf16>
    %cst_116 = arith.constant dense<0.000000e+00> : vector<8x8xf32>
    %168 = tpu.matmul %167, %104, %cst_116 {dimension_numbers = #tpu.dot_dimension_numbers<[1], [0], [0], [1], [0, 0, 1, 1], [], []>} : vector<8x8xbf16>, vector<8x8xbf16>, vector<8x8xf32> -> vector<8x8xf32>
    %169 = arith.truncf %168 : vector<8x8xf32> to vector<8x8xbf16>
    %c3_117 = arith.constant 3 : index
    %c0_118 = arith.constant 0 : index
    %c0_119 = arith.constant 0 : index
    %170 = vector.load %arg10[%c3_117, %c0_118, %c0_119] : memref<4x8x32xbf16, #tpu.memory_space<vmem>>, vector<1x8x32xbf16>
    %171 = vector.shape_cast %170 : vector<1x8x32xbf16> to vector<8x32xbf16>
    %cst_120 = arith.constant dense<0.000000e+00> : vector<8x32xf32>
    %172 = tpu.matmul %169, %171, %cst_120 {dimension_numbers = #tpu.dot_dimension_numbers<[1], [0], [0], [1], [0, 0, 1, 1], [], []>} : vector<8x8xbf16>, vector<8x32xbf16>, vector<8x32xf32> -> vector<8x32xf32>
    %173 = arith.addf %156, %172 : vector<8x32xf32>
    %c0_121 = arith.constant 0 : index
    %c0_122 = arith.constant 0 : index
    %174 = vector.load %arg11[%c0_121, %c0_122] : memref<1x32xf32, #tpu.memory_space<vmem>>, vector<1x32xf32>
    %175 = vector.broadcast %174 : vector<1x32xf32> to vector<8x32xf32>
    %176 = arith.addf %173, %175 : vector<8x32xf32>
    %c0_123 = arith.constant 0 : index
    %c0_124 = arith.constant 0 : index
    %c0_125 = arith.constant 0 : index
    %177 = vector.load %arg12[%c0_123, %c0_124, %c0_125] : memref<1x8x32xf32, #tpu.memory_space<vmem>>, vector<1x8x32xf32>
    %178 = vector.shape_cast %177 : vector<1x8x32xf32> to vector<8x32xf32>
    %179 = vector.shape_cast %176 : vector<8x32xf32> to vector<1x8x32xf32>
    tpu.vector_store %arg12[%c0_123, %c0_124, %c0_125], %179 {strides = array<i32>} : memref<1x8x32xf32, #tpu.memory_space<vmem>>, vector<1x8x32xf32>,
    %180 = tpu.concatenate %115, %132, %149, %166 in 1 : vector<8x8xf32>, vector<8x8xf32>, vector<8x8xf32>, vector<8x8xf32> -> vector<8x32xf32>
    %c0_126 = arith.constant 0 : index
    %c0_127 = arith.constant 0 : index
    %c0_128 = arith.constant 0 : index
    %181 = vector.load %arg13[%c0_126, %c0_127, %c0_128] : memref<1x8x32xf32, #tpu.memory_space<vmem>>, vector<1x8x32xf32>
    %182 = vector.shape_cast %181 : vector<1x8x32xf32> to vector<8x32xf32>
    %183 = vector.shape_cast %180 : vector<8x32xf32> to vector<1x8x32xf32>
    tpu.vector_store %arg13[%c0_126, %c0_127, %c0_128], %183 {strides = array<i32>} : memref<1x8x32xf32, #tpu.memory_space<vmem>>, vector<1x8x32xf32>,
    return
  }
  func.func @transform_0(%arg0: i32) -> (i32, i32, i32) {
    %c0_i32 = arith.constant 0 : i32
    %c0_i32_0 = arith.constant 0 : i32
    %c0_i32_1 = arith.constant 0 : i32
    return %arg0, %c0_i32, %c0_i32_0 : i32, i32, i32
  }
  func.func @transform_1(%arg0: i32) -> (i32, i32, i32) {
    %c0_i32 = arith.constant 0 : i32
    %c0_i32_0 = arith.constant 0 : i32
    %c0_i32_1 = arith.constant 0 : i32
    return %arg0, %c0_i32, %c0_i32_0 : i32, i32, i32
  }
  func.func @transform_2(%arg0: i32) -> (i32, i32, i32) {
    %c0_i32 = arith.constant 0 : i32
    %c0_i32_0 = arith.constant 0 : i32
    %c0_i32_1 = arith.constant 0 : i32
    return %arg0, %c0_i32, %c0_i32_0 : i32, i32, i32
  }
  func.func @transform_3(%arg0: i32) -> (i32, i32, i32) {
    %c0_i32 = arith.constant 0 : i32
    %c0_i32_0 = arith.constant 0 : i32
    %c0_i32_1 = arith.constant 0 : i32
    %c0_i32_2 = arith.constant 0 : i32
    return %c0_i32, %c0_i32_0, %c0_i32_1 : i32, i32, i32
  }
  func.func @transform_4(%arg0: i32) -> (i32, i32, i32) {
    %c0_i32 = arith.constant 0 : i32
    %c0_i32_0 = arith.constant 0 : i32
    %c0_i32_1 = arith.constant 0 : i32
    %c0_i32_2 = arith.constant 0 : i32
    return %c0_i32, %c0_i32_0, %c0_i32_1 : i32, i32, i32
  }
  func.func @transform_5(%arg0: i32) -> (i32, i32, i32) {
    %c0_i32 = arith.constant 0 : i32
    %c0_i32_0 = arith.constant 0 : i32
    %c0_i32_1 = arith.constant 0 : i32
    %c0_i32_2 = arith.constant 0 : i32
    return %c0_i32, %c0_i32_0, %c0_i32_1 : i32, i32, i32
  }
  func.func @transform_6(%arg0: i32) -> (i32, i32, i32) {
    %c0_i32 = arith.constant 0 : i32
    %c0_i32_0 = arith.constant 0 : i32
    %c0_i32_1 = arith.constant 0 : i32
    %c0_i32_2 = arith.constant 0 : i32
    return %c0_i32, %c0_i32_0, %c0_i32_1 : i32, i32, i32
  }
  func.func @transform_7(%arg0: i32) -> (i32, i32, i32) {
    %c0_i32 = arith.constant 0 : i32
    %c0_i32_0 = arith.constant 0 : i32
    %c0_i32_1 = arith.constant 0 : i32
    %c0_i32_2 = arith.constant 0 : i32
    return %c0_i32, %c0_i32_0, %c0_i32_1 : i32, i32, i32
  }
  func.func @transform_8(%arg0: i32) -> (i32, i32, i32) {
    %c0_i32 = arith.constant 0 : i32
    %c0_i32_0 = arith.constant 0 : i32
    %c0_i32_1 = arith.constant 0 : i32
    %c0_i32_2 = arith.constant 0 : i32
    return %c0_i32, %c0_i32_0, %c0_i32_1 : i32, i32, i32
  }
  func.func @transform_9(%arg0: i32) -> (i32, i32, i32) {
    %c0_i32 = arith.constant 0 : i32
    %c0_i32_0 = arith.constant 0 : i32
    %c0_i32_1 = arith.constant 0 : i32
    %c0_i32_2 = arith.constant 0 : i32
    return %c0_i32, %c0_i32_0, %c0_i32_1 : i32, i32, i32
  }
  func.func @transform_10(%arg0: i32) -> (i32, i32) {
    %c0_i32 = arith.constant 0 : i32
    %c0_i32_0 = arith.constant 0 : i32
    %c0_i32_1 = arith.constant 0 : i32
    return %c0_i32, %c0_i32_0 : i32, i32
  }
  func.func @transform_11(%arg0: i32) -> (i32, i32, i32) {
    %c0_i32 = arith.constant 0 : i32
    %c0_i32_0 = arith.constant 0 : i32
    %c0_i32_1 = arith.constant 0 : i32
    return %arg0, %c0_i32, %c0_i32_0 : i32, i32, i32
  }
  func.func @transform_12(%arg0: i32) -> (i32, i32, i32) {
    %c0_i32 = arith.constant 0 : i32
    %c0_i32_0 = arith.constant 0 : i32
    %c0_i32_1 = arith.constant 0 : i32
    return %arg0, %c0_i32, %c0_i32_0 : i32, i32, i32
  }
}

</mosaic_0001>

<bundles_post_ra>
// kernel: tpu_custom_call.1
= control target key start
LH: loop header
LB: loop body
LE: loop exit
PB: predicated region body
PF: predicated region fallthrough
CT: control target
= control target key end

     0   :  { %s3099_s0 = inlined_call_operand.vmem [shape: f32[2,8,32], index: 0, kind: input, shape index: {}]   ;;  %s3100_s1 = inlined_call_operand.vmem [shape: f32[2,8,32], index: 1, kind: input, shape index: {}]   ;;  %s3101_s2 = inlined_call_operand.vmem [shape: f32[2,8,32], index: 2, kind: input, shape index: {}]   ;;  %s3102_s3 = inlined_call_operand.vmem [shape: bf16[4,32,8], index: 3, kind: input, shape index: {}]   ;;  %s3103_s4 = inlined_call_operand.vmem [shape: f32[4,1,8], index: 4, kind: input, shape index: {}]   ;;  %s3104_s5 = inlined_call_operand.vmem [shape: bf16[4,32,8], index: 5, kind: input, shape index: {}]   ;;  %s3105_s6 = inlined_call_operand.vmem [shape: f32[4,1,8], index: 6, kind: input, shape index: {}]   ;;  %s3106_s7 = inlined_call_operand.vmem [shape: bf16[4,32,8], index: 7, kind: input, shape index: {}]   ;;  %s3107_s8 = inlined_call_operand.vmem [shape: f32[4,1,8], index: 8, kind: input, shape index: {}]   ;;  %s3108_s9 = inlined_call_operand.vmem [shape: bf16[4,8,32], index: 9, kind: input, shape index: {}]   ;;  %s3109_s10 = inlined_call_operand.vmem [shape: f32[1,32], index: 10, kind: input, shape index: {}]   ;;  %s3110_s11 = inlined_call_operand.hbm [shape: f32[2,8,32], index: 11, kind: output, shape index: {0}]   ;;  %s3111_s12 = inlined_call_operand.hbm [shape: f32[2,8,32], index: 12, kind: output, shape index: {1}]  }
   0x1   :  { %3114 = sst [smem:[#allocation9_spill]] %s3099_s0 }
   0x2   :  { %3115 = sst [smem:[#allocation10_spill]] %s3100_s1 }
   0x3   :  { %18 = vsyncpa [#allocation3], 0 }
   0x4   :  { %20 = vsyncpa [#allocation3 + $0x1], 0 }
   0x5   :  { %21 = vsyncpa [#allocation5], 0 }
   0x6   :  { %23 = vsyncpa [#allocation5 + $0x1], 0  ;;  %s2655_s21 = smov 0   ;;  %s2657_s22 = smov 0  }
   0x7   :  { %s2659_s23 = smov 0   ;;  %s2661_s24 = smov 0  }
   0x8 LB: > { %s2676_s25 = sadd.s32 4294967295, %s2581_s24   ;;  %s2046_s26 = sadd.s32 4294967294, %s2581_s24   ;;  %s2581_s24 = sphi %s2661_s24, %s3127_s24   ;;  %s2577_s23 = sphi %s2659_s23, %s3126_s23   ;;  %s2573_s22 = sphi %s2657_s22, %s3125_s22   ;;  %s2569_s21 = sphi %s2655_s21, %s3124_s21  }
   0x9   : > { %s2680_s27 = sadd.s32 1, %s2581_s24   ;;  %s282_s28 = sadd.s32 1, %s2577_s23 }
   0xa   : > { %s279_s29 = ssub.s32 %s2581_s24, %s2680_s27  ;;  %p292_p0 = scmp.ne.s32.totalorder %s2577_s23, %s2573_s22 }
   0xb   : > { %p280_p1 = scmp.eq.s32.totalorder %s279_s29, 0  ;;  %p293_p2 = scmp.eq.s32.totalorder %s2676_s25, 1 }
   0xc   : > { %p298_p3 = scmp.ne.s32.totalorder %s2573_s22, %s2569_s21  ;;  %p299_p4 = scmp.eq.s32.totalorder %s2046_s26, 1 }
   0xd   : > { %s2691_s30 = scalar_select %p280_p1, %s2577_s23, %s282_s28  }
   0xe   : > { %p2693_p5 = por %p293_p2, %p292_p0  ;;  %p2697_p6 = por %p299_p4, %p298_p3 }
   0xf   : > { %3116 = sst [smem:[#allocation8_spill]] %s2691_s30  ;;  %p2049_p7 = scmp.ge.s32.totalorder %s2581_s24, 1 }
  0x10   : > { %p388_p8 = scmp.lt.s32.totalorder %s2581_s24, 3 }
  0x12   : > { %p389_p9 = pnand %p2049_p7, %p388_p8 }
  0x13   : > { %v2447_v0 = vld [vmem:[%s3102_s3] sm:$0xff] (!%p389_p9)   ;;  %v2583_v1 = vmov (!%p389_p9), 0.0   ;;  %v2449_v3 = vld [vmem:[%s3102_s3 + $0x8] sm:$0xff] (!%p389_p9)   ;;  %vm2584_vm0 = vmmov (!%p389_p9), 0   ;;  %p442_p10 = scmp.lt.s32.totalorder (!%p389_p9), %s2676_s25, 1  ;;  %s3119_s0 = sld [smem:[#allocation9_spill]] (!%p389_p9) }
  0x14   : > { %392 = sbr.rel (%p389_p9) target bundleno = 2532 (0x9e4), region = 64  ;;  %2230 = vmatprep.subr.bf16.mxu0 (!%p389_p9), %v2583_v1  ;;  %2238 = vmatprep.subr.bf16.mxu1 (!%p389_p9), %v2583_v1  ;;  %v2448_v2 = vld [vmem:[%s3104_s5] sm:$0xff] (!%p389_p9)   ;;  %v2450_v4 = vld [vmem:[%s3104_s5 + $0x8] sm:$0xff] (!%p389_p9)   ;;  %s3120_s1 = sld [smem:[#allocation10_spill]] (!%p389_p9)  ;;  %vm484_vm1 = vcmask (!%p389_p9), 261120   ;;  %v2455_v10 = vld [vmem:[%s3102_s3 + $0x10] sm:$0xff] (!%p389_p9)  }
  0x15   : > { %2231 = vmatpush3.bf16.msra.mxu0 (!%p389_p9), %v2447_v0  ;;  %2234 = vmatprep.mubr.msk.bf16.mxu0 (!%p389_p9), %vm2584_vm0, %v2583_v1  ;;  %v2451_v5 = vld [vmem:[%s3106_s7] sm:$0xff] (!%p389_p9)   ;;  %v2452_v11 = vld [vmem:[%s3106_s7 + $0x8] sm:$0xff] (!%p389_p9)   ;;  %v2456_v13 = vld [vmem:[%s3102_s3 + $0x18] sm:$0xff] (!%p389_p9)   ;;  %vm1257_vm2 = vcmask (!%p389_p9), 64512   ;;  %vm1319_vm3 = vcmask (!%p389_p9), 1043456   ;;  %s2585_s16 = smov (!%p389_p9), 8  }
  0x16   : > { %2239 = vmatpush3.bf16.msra.mxu1 (!%p389_p9), %v2448_v2  ;;  %2232 = vmatprep.subr.bf16.mxu0 (!%p389_p9), %v2583_v1  ;;  %v2453_v15 = vld [vmem:[%s3104_s5 + $0x10] sm:$0xff] (!%p389_p9)   ;;  %v2454_v17 = vld [vmem:[%s3104_s5 + $0x18] sm:$0xff] (!%p389_p9)   ;;  %v2457_v19 = vld [vmem:[%s3102_s3 + $0x20] sm:$0xff] (!%p389_p9)   ;;  %vm1894_vm4 = vcmask (!%p389_p9), 130048   ;;  %vm1896_vm5 = vcmask (!%p389_p9), 195584   ;;  %s3113_s28 = sshll.u32 (!%p389_p9), %s2676_s25, 7 }
  0x17   : > { %2240 = vmatprep.subr.bf16.mxu1 (!%p389_p9), %v2583_v1  ;;  %2242 = vmatprep.mubr.msk.bf16.mxu1 (!%p389_p9), %vm2584_vm0, %v2583_v1  ;;  %v2459_v16 = vld [vmem:[%s3106_s7 + $0x10] sm:$0xff] (!%p389_p9)   ;;  %v2461_v18 = vld [vmem:[%s3106_s7 + $0x18] sm:$0xff] (!%p389_p9)   ;;  %v2463_v20 = vld [vmem:[%s3104_s5 + $0x20] sm:$0xff] (!%p389_p9)  }
  0x18   : > { %v2458_v21 = vld [vmem:[%s3102_s3 + $0x28] sm:$0xff] (!%p389_p9)   ;;  %v2460_v23 = vld [vmem:[%s3106_s7 + $0x20] sm:$0xff] (!%p389_p9)   ;;  %v2467_v24 = vld [vmem:[%s3102_s3 + $0x30] sm:$0xff] (!%p389_p9)  }
  0x19   : > { %2233 = vmatpush3.bf16.msra.mxu0 (!%p389_p9), %v2449_v3  ;;  %v2465_v22 = vld [vmem:[%s3104_s5 + $0x28] sm:$0xff] (!%p389_p9)   ;;  %v2464_v26 = vld [vmem:[%s3104_s5 + $0x30] sm:$0xff] (!%p389_p9)   ;;  %v2466_v27 = vld [vmem:[%s3104_s5 + $0x38] sm:$0xff] (!%p389_p9)  }
  0x1a   : > { %2241 = vmatpush3.bf16.msra.mxu1 (!%p389_p9), %v2450_v4  ;;  %2246 = vmatprep.subr.bf16.mxu0 (!%p389_p9), %v2583_v1  ;;  %v2462_v25 = vld [vmem:[%s3106_s7 + $0x28] sm:$0xff] (!%p389_p9)   ;;  %v2468_v28 = vld [vmem:[%s3102_s3 + $0x38] sm:$0xff] (!%p389_p9)   ;;  %v2469_v29 = vld [vmem:[%s3106_s7 + $0x30] sm:$0xff] (!%p389_p9)  }
  0x1b   : > { %s443_s29 = scalar_select %p442_p10, %s2676_s25, 1  ;;  %2254 = vmatprep.subr.bf16.mxu1 %v2583_v1  ;;  %v2470_v30 = vld [vmem:[%s3106_s7 + $0x38] sm:$0xff]   ;;  %v2059_v31 = vld [vmem:[%s3105_s6] ss:$0 sm:$0xff]  ;;  %v2081_v58 = vld [vmem:[%s3105_s6 + $0x1] ss:$0 sm:$0xff] }
  0x1c   : > { %v2055_v42 = vld [vmem:[%s3103_s4] ss:$0 sm:$0xff]  ;;  %v2072_v63 = vld [vmem:[%s3103_s4 + $0x1] ss:$0 sm:$0xff] }
  0x1d   : > { %s2052_s15 = sshll.u32 %s443_s29, 3  ;;  %v2063_v44 = vld [vmem:[%s3107_s8] ss:$0 sm:$0xff] }
  0x1e   : > { %s445_s18 = scalar_lea.vmem %s3119_s0, %s2052_s15  ;;  %s449_s30 = scalar_lea.vmem %s3120_s1, %s2052_s15 }
  0x1f   : > { %v455_v6 = vld [vmem:[%s445_s18] sm:$0xff]  ;;  %s453_s17 = scalar_lea.vmem %s3101_s2, %s2052_s15  ;;  %s3009_s18 = sand.u32 1, %s2573_s22  }
  0x20   : > { %v457_v7 = vld [vmem:[%s449_s30] sm:$0xff]  ;;  %v2736_v8 = vpack.c.bf16 %v455_v6, %v455_v6  ;;  %s2587_s30 = smov 24   ;;  %s3112_s15 = sshll.u32 %s3009_s18, 3 }
  0x21   : > { %v2738_v9 = vpack.c.bf16 %v457_v7, %v457_v7  ;;  %v459_v12 = vld [vmem:[%s453_s17] sm:$0xff]  ;;  %s2586_s17 = smov 16   ;;  %s441_s26 = scalar_lea.vmem [#allocation4], %s3112_s15 }
  0x22   : > { %2235 = vmatmul.mubr.msk.bf16.vlgmr.msra.gmra.mrb[0].mxu0 %vm484_vm1, %v2736_v8  ;;  %v2762_v14 = vpack.c.bf16 %v459_v12, %v459_v12  ;;  %s1931_s19 = sshll.u32 %s441_s26, 4  ;;  %s1905_s20 = scalar_lea.sflag [#allocation5], %s3009_s18  ;;  %s1932_s19 = int_to_ptr.vmem [resolvable:$true] %s1931_s19 }
  0x23   : > { %2243 = vmatmul.mubr.msk.bf16.vlgmr.msra.gmra.mrb[0].mxu1 %vm484_vm1, %v2738_v9  ;;  %2247 = vmatpush3.bf16.msra.mxu0 %v2451_v5  ;;  %s2588_s15 = smov [#allocation4]  }
  0x24   : > { %2250 = vmatprep.mubr.msk.bf16.mxu0 %vm2584_vm0, %v2583_v1  ;;  %2248 = vmatprep.subr.bf16.mxu0 %v2583_v1  ;;  %s2491_s0 = sshll.u32 %s2588_s15, 4  ;;  %s2492_s0 = int_to_ptr.vmem [resolvable:$false] %s2491_s0 }
  0x25   : > { %2255 = vmatpush3.bf16.msra.mxu1 %v2455_v10  ;;  %2258 = vmatprep.mubr.msk.bf16.mxu1 %vm2584_vm0, %v2583_v1  ;;  %s2493_s1 = scalar_lea.vmem %s2492_s0, 256  ;;  %p2494_p0 = scmp.lt.s32.totalorder %s1932_s19, %s2492_s0 }
  0x26   : > { %2256 = vmatprep.subr.bf16.mxu1 %v2583_v1 }
  0x27   : > { %2249 = vmatpush3.bf16.msra.mxu0 %v2452_v11 }
  0x28   : > { %2262 = vmatprep.subr.bf16.mxu0 %v2583_v1 }
  0x29   : > { %2257 = vmatpush3.bf16.msra.mxu1 %v2456_v13 }
  0x2a   : > { %2270 = vmatprep.subr.bf16.mxu1 %v2583_v1  ;;  %2251 = vmatmul.mubr.msk.bf16.vlgmr.msra.gmra.mrb[4].mxu0 %vm484_vm1, %v2762_v14 }
  0x2b   : > { %2263 = vmatpush3.bf16.msra.mxu0 %v2453_v15  ;;  %2266 = vmatprep.mubr.msk.bf16.mxu0 %vm2584_vm0, %v2583_v1 }
  0x2c   : > { %2264 = vmatprep.subr.bf16.mxu0 %v2583_v1  ;;  %2259 = vmatmul.mubr.msk.bf16.vlgmr.msra.gmra.mrb[4].mxu1 %vm484_vm1, %v2736_v8 }
  0x2d   : > { %2271 = vmatpush3.bf16.msra.mxu1 %v2459_v16  ;;  %2274 = vmatprep.mubr.msk.bf16.mxu1 %vm2584_vm0, %v2583_v1 }
  0x2e   : > { %2272 = vmatprep.subr.bf16.mxu1 %v2583_v1 }
  0x2f   : > { %2265 = vmatpush3.bf16.msra.mxu0 %v2454_v17 }
  0x30   : > { %2278 = vmatprep.subr.bf16.mxu0 %v2583_v1 }
  0x31   : > { %2273 = vmatpush3.bf16.msra.mxu1 %v2461_v18 }
  0x32   : > { %2267 = vmatmul.mubr.msk.bf16.vlgmr.msra.gmra.mrb[8].mxu0 %vm484_vm1, %v2738_v9  ;;  %2286 = vmatprep.subr.bf16.mxu1 %v2583_v1 }
  0x33   : > { %2279 = vmatpush3.bf16.msra.mxu0 %v2457_v19  ;;  %2282 = vmatprep.mubr.msk.bf16.mxu0 %vm2584_vm0, %v2583_v1 }
  0x34   : > { %2280 = vmatprep.subr.bf16.mxu0 %v2583_v1  ;;  %2275 = vmatmul.mubr.msk.bf16.vlgmr.msra.gmra.mrb[8].mxu1 %vm484_vm1, %v2762_v14 }
  0x35   : > { %2287 = vmatpush3.bf16.msra.mxu1 %v2463_v20  ;;  %2290 = vmatprep.mubr.msk.bf16.mxu1 %vm2584_vm0, %v2583_v1 }
  0x36   : > { %2288 = vmatprep.subr.bf16.mxu1 %v2583_v1 }
  0x37   : > { %2281 = vmatpush3.bf16.msra.mxu0 %v2458_v21 }
  0x38   : > { %2294 = vmatprep.subr.bf16.mxu0 %v2583_v1 }
  0x39   : > { %2289 = vmatpush3.bf16.msra.mxu1 %v2465_v22 }
  0x3a   : > { %2283 = vmatmul.mubr.msk.bf16.vlgmr.msra.gmra.mrb[12].mxu0 %vm484_vm1, %v2736_v8  ;;  %2302 = vmatprep.subr.bf16.mxu1 %v2583_v1 }
  0x3b   : > { %2295 = vmatpush3.bf16.msra.mxu0 %v2460_v23  ;;  %2298 = vmatprep.mubr.msk.bf16.mxu0 %vm2584_vm0, %v2583_v1 }
  0x3c   : > { %2296 = vmatprep.subr.bf16.mxu0 %v2583_v1  ;;  %2291 = vmatmul.mubr.msk.bf16.vlgmr.msra.gmra.mrb[12].mxu1 %vm484_vm1, %v2738_v9 }
  0x3d   : > { %2303 = vmatpush3.bf16.msra.mxu1 %v2467_v24  ;;  %2306 = vmatprep.mubr.msk.bf16.mxu1 %vm2584_vm0, %v2583_v1 }
  0x3e   : > { %2304 = vmatprep.subr.bf16.mxu1 %v2583_v1 }
  0x3f   : > { %2297 = vmatpush3.bf16.msra.mxu0 %v2462_v25 }
  0x40   : > { %2310 = vmatprep.subr.bf16.mxu0 %v2583_v1 }
  0x41   : > { %2305 = vmatpush3.bf16.msra.mxu1 %v2468_v28 }
  0x42   : > { %2299 = vmatmul.mubr.msk.bf16.vlgmr.msra.gmra.mrb[16].mxu0 %vm484_vm1, %v2762_v14  ;;  %2318 = vmatprep.subr.bf16.mxu1 %v2583_v1 }
  0x43   : > { %2311 = vmatpush3.bf16.msra.mxu0 %v2464_v26  ;;  %2314 = vmatprep.mubr.msk.bf16.mxu0 %vm2584_vm0, %v2583_v1 }
  0x44   : > { %2312 = vmatprep.subr.bf16.mxu0 %v2583_v1  ;;  %2307 = vmatmul.mubr.msk.bf16.vlgmr.msra.gmra.mrb[16].mxu1 %vm484_vm1, %v2736_v8 }
  0x45   : > { %2319 = vmatpush3.bf16.msra.mxu1 %v2469_v29  ;;  %2322 = vmatprep.mubr.msk.bf16.mxu1 %vm2584_vm0, %v2583_v1 }
  0x46   : > { %2320 = vmatprep.subr.bf16.mxu1 %v2583_v1 }
  0x47   : > { %2313 = vmatpush3.bf16.msra.mxu0 %v2466_v27 }
  0x48   : > { %2326 = vmatprep.subr.bf16.mxu0 %v2583_v1 }
  0x49   : > { %2321 = vmatpush3.bf16.msra.mxu1 %v2470_v30 }
  0x4a   : > { %2315 = vmatmul.mubr.msk.bf16.vlgmr.msra.gmra.mrb[20].mxu0 %vm484_vm1, %v2738_v9  ;;  %2332 = vmatprep.subr.bf16.mxu1 %v2583_v1 }
  0x4b   : > { %2328 = vmatprep.mubr.msk.bf16.mxu0 %vm2584_vm0, %v2583_v1 }
  0x4c   : > { %2323 = vmatmul.mubr.msk.bf16.vlgmr.msra.gmra.mrb[20].mxu1 %vm484_vm1, %v2762_v14 }
  0x4d   : > { %2334 = vmatprep.mubr.msk.bf16.mxu1 %vm2584_vm0, %v2583_v1 }
  0xf5   : > { %v522_v32 = vpop.f32.mrb[0].mxu0 }
  0xf6   : > { %v589_v33 = vpop.f32.mrb[0].mxu1  ;;  %v2236_v35 = vpop.f32.mrb[1].mxu0  ;;  %v523_v45 = vadd.f32 %v2055_v42, %v522_v32 }
  0xf7   : > { %v590_v34 = vadd.f32 %v2059_v31, %v589_v33  ;;  %v2244_v36 = vpop.f32.mrb[1].mxu1  ;;  %v525_v37 = vpop.f32.mrb[2].mxu0 }
  0xf8   : > { %v592_v38 = vpop.f32.mrb[2].mxu1  ;;  %v2237_v40 = vpop.f32.mrb[3].mxu0  ;;  %v528_v51 = vpack.c.bf16 %v523_v45, %v523_v45 }
  0xf9   : > { %v595_v39 = vpack.c.bf16 %v590_v34, %v590_v34  ;;  %v2245_v41 = vpop.f32.mrb[3].mxu1 }
  0xfb   : > { %v1262_v43 = vsel %vm1257_vm2, %v595_v39, 0 }
  0xfc   : > { %2327 = vmatpush3.bf16.xpose.msra.mxu0 %v1262_v43 }
  0xfd   : > { %2338 = vmatprep.subr.bf16.mxu0 %v2583_v1  ;;  %v656_v46 = vpop.f32.mrb[4].mxu0 }
  0xfe   : > { %v657_v47 = vadd.f32 %v2063_v44, %v656_v46  ;;  %v2252_v48 = vpop.f32.mrb[5].mxu0 }
  0xff   : > { %v659_v49 = vpop.f32.mrb[6].mxu0  ;;  %v722_v50 = vpop.f32.mrb[4].mxu1 }
 0x100   : > { %v662_v52 = vpack.c.bf16 %v657_v47, %v657_v47  ;;  %v2253_v53 = vpop.f32.mrb[7].mxu0  ;;  %v2260_v54 = vpop.f32.mrb[5].mxu1  ;;  %v723_v4 = vadd.f32 %v2072_v63, %v722_v50 }
 0x101   : > { %v725_v55 = vpop.f32.mrb[6].mxu1 }
 0x102   : > { %v1321_v56 = vsel %vm1319_vm3, %v662_v52, 0  ;;  %v2261_v57 = vpop.f32.mrb[7].mxu1  ;;  %v728_v6 = vpack.c.bf16 %v723_v4, %v723_v4  ;;  %v2090_v55 = vld [vmem:[%s3107_s8 + $0x1] ss:$0 sm:$0xff] }
 0x103   : > { %2329 = vmatmul.mubr.msk.bf16.vlgmr.msra.gmra.mrb[24].mxu0 %vm1257_vm2, %v528_v51  ;;  %2333 = vmatpush3.bf16.msra.mxu1 %v1321_v56 }
 0x104   : > { %2340 = vmatprep.mubr.msk.bf16.mxu0 %vm2584_vm0, %v2583_v1  ;;  %2344 = vmatprep.subr.bf16.mxu1 %v2583_v1 }
 0x105   : > { %v788_v59 = vpop.f32.mrb[8].mxu0 }
 0x106   : > { %v789_v60 = vadd.f32 %v2081_v58, %v788_v59  ;;  %v2268_v61 = vpop.f32.mrb[9].mxu0 }
 0x107   : > { %v791_v62 = vpop.f32.mrb[10].mxu0  ;;  %v854_v38 = vpop.f32.mrb[8].mxu1 }
 0x108   : > { %v794_v0 = vpack.c.bf16 %v789_v60, %v789_v60  ;;  %v2269_v2 = vpop.f32.mrb[11].mxu0  ;;  %v2276_v39 = vpop.f32.mrb[9].mxu1  ;;  %v855_v56 = vadd.f32 %v2090_v55, %v854_v38 }
 0x109   : > { %v857_v40 = vpop.f32.mrb[10].mxu1 }
 0x10a   : > { %v1369_v3 = vsel %vm1257_vm2, %v794_v0, 0  ;;  %v2277_v41 = vpop.f32.mrb[11].mxu1  ;;  %v860_v57 = vpack.c.bf16 %v855_v56, %v855_v56  ;;  %v1364_v0 = vld [vmem:[%s3108_s9] sm:$0xf] }
 0x10b   : > { %2339 = vmatpush3.bf16.xpose.msra.mxu0 %v1369_v3  ;;  %v1522_v4 = vsel %vm1319_vm3, %v1364_v0, 0 }
 0x10c   : > { %2350 = vmatprep.subr.bf16.mxu0 %v2583_v1  ;;  %v1427_v60 = vsel %vm1319_vm3, %v860_v57, 0 }
 0x10d   : > { %v2894_v5 = vpop.f32.mrb[12].mxu0 }
 0x10e   : > { %v2284_v7 = vpop.f32.mrb[13].mxu0 }
 0x10f   : > { %v923_v8 = vpop.f32.mrb[14].mxu0  ;;  %v986_v42 = vpop.f32.mrb[12].mxu1 }
 0x110   : > { %v2285_v9 = vpop.f32.mrb[15].mxu0  ;;  %v2292_v43 = vpop.f32.mrb[13].mxu1  ;;  %v2117_v8 = vld [vmem:[%s3107_s8 + $0x2] ss:$0 sm:$0xff] }
 0x111   : > { %v989_v44 = vpop.f32.mrb[14].mxu1 }
 0x112   : > { %2341 = vmatmul.mubr.msk.bf16.vlgmr.msra.gmra.mrb[28].mxu0 %vm1257_vm2, %v728_v6  ;;  %v2293_v45 = vpop.f32.mrb[15].mxu1  ;;  %v2152_v6 = vld [vmem:[%s3108_s9 + $0x4] sm:$0xf] }
 0x113   : > { %2352 = vmatprep.mubr.msk.bf16.mxu0 %vm2584_vm0, %v2583_v1  ;;  %v1476_v7 = vsel %vm1319_vm3, %v2152_v6, 0 }
 0x114   : > { %2351 = vmatpush3.bf16.msra.mxu0 %v1476_v7 }
 0x115   : > { %v2899_v10 = vpop.f32.mrb[16].mxu0  ;;  %2362 = vmatprep.subr.bf16.mxu0 %v2583_v1 }
 0x116   : > { %v2300_v11 = vpop.f32.mrb[17].mxu0  ;;  %v1053_v9 = vadd.f32 %v2117_v8, %v2899_v10  ;;  %v2108_v10 = vld [vmem:[%s3105_s6 + $0x2] ss:$0 sm:$0xff] }
 0x117   : > { %v1055_v12 = vpop.f32.mrb[18].mxu0  ;;  %v2907_v46 = vpop.f32.mrb[16].mxu1 }
 0x118   : > { %v2301_v13 = vpop.f32.mrb[19].mxu0  ;;  %v2308_v47 = vpop.f32.mrb[17].mxu1  ;;  %v1058_v11 = vpack.c.bf16 %v1053_v9, %v1053_v9 }
 0x119   : > { %v1121_v48 = vpop.f32.mrb[18].mxu1 }
 0x11a   : > { %v2309_v49 = vpop.f32.mrb[19].mxu1 }
 0x11b   : > { %v2157_v49 = vld [vmem:[%s3108_s9 + $0x8] sm:$0xf] }
 0x11d   : > { %v2901_v14 = vpop.f32.mrb[20].mxu0 }
 0x11e   : > { %v2316_v15 = vpop.f32.mrb[21].mxu0 }
 0x11f   : > { %v1187_v16 = vpop.f32.mrb[22].mxu0  ;;  %v2909_v50 = vpop.f32.mrb[20].mxu1 }
 0x120   : > { %v2317_v17 = vpop.f32.mrb[23].mxu0  ;;  %v2324_v51 = vpop.f32.mrb[21].mxu1 }
 0x121   : > { %v1253_v52 = vpop.f32.mrb[22].mxu1  ;;  %v1626_v17 = vsel %vm1319_vm3, %v1058_v11, 0  ;;  %v1675_v51 = vsel %vm1319_vm3, %v2157_v49, 0 }
 0x122   : > { %v2325_v53 = vpop.f32.mrb[23].mxu1 }
 0x123   : > { %v2135_v53 = vld [vmem:[%s3105_s6 + $0x3] ss:$0 sm:$0xff] }
 0x1d6   : > { %v1298_v18 = vpop.f32.mrb[24].mxu0 }
 0x1d7   : > { %v2330_v19 = vpop.f32.mrb[25].mxu0  ;;  %v1304_v20 = vsel %vm1257_vm2, %v1298_v18, -inf }
 0x1d8   : > { %1305 = vmax.xlane.f32.xlu0 %v1304_v20  ;;  %v1301_v21 = vpop.f32.mrb[26].mxu0  ;;  %v987_v19 = vadd.f32 %v2108_v10, %v986_v42 }
 0x1d9   : > { %v2331_v22 = vpop.f32.mrb[27].mxu0 }
 0x1da   : > { %v992_v20 = vpack.c.bf16 %v987_v19, %v987_v19 }
 0x1e5   : > { %v1405_v23 = vpop.f32.mrb[28].mxu0 }
 0x1e6   : > { %v2342_v24 = vpop.f32.mrb[29].mxu0  ;;  %v1411_v25 = vsel %vm1257_vm2, %v1405_v23, -inf }
 0x1e7   : > { %1412 = vmax.xlane.f32.xlu0 %v1411_v25  ;;  %v1408_v26 = vpop.f32.mrb[30].mxu0  ;;  %v2099_v24 = vld [vmem:[%s3103_s4 + $0x2] ss:$0 sm:$0xff] }
 0x1e8   : > { %v2343_v27 = vpop.f32.mrb[31].mxu0  ;;  %v1568_v26 = vsel %vm1257_vm2, %v992_v20, 0 }
 0x265   : > { %v1306_v28 = vpop.xlane.xlu0 %1305 }
 0x266   : > { %v1307_v29 = vsub.f32 %v1298_v18, %v1306_v28  ;;  %v921_v28 = vadd.f32 %v2099_v24, %v2894_v5 }
 0x268   : > { %v1308_v30 = vmul.f32 1.442695, %v1307_v29  ;;  %v926_v29 = vpack.c.bf16 %v921_v28, %v921_v28 }
 0x26a   : > { %2471 = vpow2.f32 %v1308_v30 }
 0x274   : > { %v2472_v31 = vpop.eup %2471  ;;  %v1413_v32 = vpop.xlane.xlu0 %1412 }
 0x275   : > { %v1310_v33 = vsel %vm1257_vm2, %v2472_v31, 0.0  ;;  %v1414_v34 = vsub.f32 %v1405_v23, %v1413_v32 }
 0x276   : > { %1311 = vadd.xlane.f32.xlu1 %v1310_v33 }
 0x277   : > { %v1415_v35 = vmul.f32 1.442695, %v1414_v34 }
 0x279   : > { %2473 = vpow2.f32 %v1415_v35 }
 0x283   : > { %v2474_v36 = vpop.eup %2473 }
 0x284   : > { %v1417_v37 = vsel %vm1257_vm2, %v2474_v36, 0.0 }
 0x285   : > { %1418 = vadd.xlane.f32.xlu1 %v1417_v37 }
 0x303   : > { %v1312_v54 = vpop.xlane.xlu1 %1311 }
 0x304   : > { %2475 = vrcp.f32 %v1312_v54  ;;  %v1185_v54 = vadd.f32 %v2135_v53, %v2901_v14 }
 0x306   : > { %v1190_v56 = vpack.c.bf16 %v1185_v54, %v1185_v54 }
 0x30e   : > { %v2476_v58 = vpop.eup %2475 }
 0x30f   : > { %v2914_v59 = vmul.f32 %v2476_v58, %v2472_v31 }
 0x311   : > { %v1315_v61 = vpack.c.bf16 %v2914_v59, %v2914_v59 }
 0x312   : > { %v1419_v62 = vpop.xlane.xlu1 %1418 }
 0x313   : > { %2335 = vmatmul.mubr.msk.bf16.vlgmr.msra.gmra.mrb[24].mxu1 %vm1257_vm2, %v1315_v61  ;;  %2477 = vrcp.f32 %v1419_v62  ;;  %v1722_v61 = vsel %vm1257_vm2, %v1190_v56, 0 }
 0x314   : > { %2345 = vmatpush3.bf16.msra.mxu1 %v1427_v60  ;;  %2346 = vmatprep.mubr.msk.bf16.mxu1 %vm2584_vm0, %v2583_v1  ;;  %v2126_v60 = vld [vmem:[%s3103_s4 + $0x3] ss:$0 sm:$0xff] }
 0x315   : > { %2356 = vmatprep.subr.bf16.mxu1 %v2583_v1  ;;  %v1119_v62 = vadd.f32 %v2126_v60, %v2907_v46 }
 0x317   : > { %v1124_v14 = vpack.c.bf16 %v1119_v62, %v1119_v62 }
 0x31d   : > { %v2478_v63 = vpop.eup %2477 }
 0x31e   : > { %v2926_v2 = vmul.f32 %v2478_v63, %v2474_v36  ;;  %v2144_v63 = vld [vmem:[%s3107_s8 + $0x3] ss:$0 sm:$0xff] }
 0x31f   : > { %v1251_v0 = vadd.f32 %v2144_v63, %v2909_v50 }
 0x320   : > { %v1422_v3 = vpack.c.bf16 %v2926_v2, %v2926_v2 }
 0x322   : > { %2347 = vmatmul.mubr.msk.bf16.vlgmr.msra.gmra.mrb[28].mxu1 %vm1257_vm2, %v1422_v3  ;;  %v1256_v3 = vpack.c.bf16 %v1251_v0, %v1251_v0 }
 0x323   : > { %2357 = vmatpush3.bf16.msra.mxu1 %v1522_v4  ;;  %2358 = vmatprep.mubr.msk.bf16.mxu1 %vm2584_vm0, %v2583_v1 }
 0x324   : > { %2368 = vmatprep.subr.bf16.mxu1 %v2583_v1  ;;  %v1780_v46 = vsel %vm1319_vm3, %v1256_v3, 0 }
 0x3e6   : > { %v1357_v12 = vpop.f32.mrb[24].mxu1 }
 0x3e7   : > { %v1363_v13 = vpack.c.bf16 %v1357_v12, %v1357_v12  ;;  %v2336_v15 = vpop.f32.mrb[25].mxu1 }
 0x3e8   : > { %v1360_v16 = vpop.f32.mrb[26].mxu1 }
 0x3e9   : > { %v2337_v18 = vpop.f32.mrb[27].mxu1  ;;  %2359 = vmatmul.mubr.msk.bf16.vlgmr.msra.gmra.mrb[32].mxu1 %vm1257_vm2, %v1363_v13 }
 0x3ea   : > { %2369 = vmatpush3.bf16.msra.mxu1 %v1626_v17  ;;  %2370 = vmatprep.mubr.msk.bf16.mxu1 %vm2584_vm0, %v2583_v1 }
 0x3eb   : > { %2380 = vmatprep.subr.bf16.mxu1 %v2583_v1 }
 0x3f5   : > { %v1463_v21 = vpop.f32.mrb[28].mxu1 }
 0x3f6   : > { %v1469_v22 = vpack.c.bf16 %v1463_v21, %v1463_v21  ;;  %v2348_v23 = vpop.f32.mrb[29].mxu1 }
 0x3f7   : > { %v1466_v25 = vpop.f32.mrb[30].mxu1 }
 0x3f8   : > { %v2349_v27 = vpop.f32.mrb[31].mxu1  ;;  %2353 = vmatmul.mubr.msk.bf16.vlgmr.msra.gmra.mrb[32].mxu0 %vm1257_vm2, %v1469_v22 }
 0x3f9   : > { %2363 = vmatpush3.bf16.xpose.msra.mxu0 %v1568_v26  ;;  %2364 = vmatprep.mubr.msk.bf16.mxu0 %vm2584_vm0, %v2583_v1 }
 0x3fa   : > { %2374 = vmatprep.subr.bf16.mxu0 %v2583_v1 }
 0x400   : > { %2365 = vmatmul.mubr.msk.bf16.vlgmr.msra.gmra.mrb[36].mxu0 %vm1257_vm2, %v926_v29 }
 0x401   : > { %2376 = vmatprep.mubr.msk.bf16.mxu0 %vm2584_vm0, %v2583_v1  ;;  %2375 = vmatpush3.bf16.msra.mxu0 %v1675_v51 }
 0x402   : > { %2386 = vmatprep.subr.bf16.mxu0 %v2583_v1 }
 0x4bc   : > { %v1558_v30 = vpop.f32.mrb[32].mxu1 }
 0x4bd   : > { %v2360_v31 = vpop.f32.mrb[33].mxu1 }
 0x4be   : > { %v1561_v32 = vpop.f32.mrb[34].mxu1 }
 0x4bf   : > { %v2361_v33 = vpop.f32.mrb[35].mxu1 }
 0x4cb   : > { %v1512_v34 = vpop.f32.mrb[32].mxu0 }
 0x4cc   : > { %v2964_v35 = vadd.f32 %v1558_v30, %v1512_v34  ;;  %v2354_v36 = vpop.f32.mrb[33].mxu0 }
 0x4cd   : > { %v1515_v37 = vpop.f32.mrb[34].mxu0 }
 0x4ce   : > { %v2355_v38 = vpop.f32.mrb[35].mxu0 }
 0x4d3   : > { %v1604_v39 = vpop.f32.mrb[36].mxu0 }
 0x4d4   : > { %v2366_v5 = vpop.f32.mrb[37].mxu0  ;;  %v1610_v40 = vsel %vm1257_vm2, %v1604_v39, -inf }
 0x4d5   : > { %1611 = vmax.xlane.f32.xlu0 %v1610_v40  ;;  %v1607_v41 = vpop.f32.mrb[38].mxu0 }
 0x4d6   : > { %v2367_v42 = vpop.f32.mrb[39].mxu0 }
 0x562   : > { %v1612_v43 = vpop.xlane.xlu0 %1611 }
 0x563   : > { %v1613_v44 = vsub.f32 %v1604_v39, %v1612_v43 }
 0x565   : > { %v1614_v45 = vmul.f32 1.442695, %v1613_v44 }
 0x567   : > { %2479 = vpow2.f32 %v1614_v45 }
 0x571   : > { %v2480_v47 = vpop.eup %2479 }
 0x572   : > { %v1616_v48 = vsel %vm1257_vm2, %v2480_v47, 0.0 }
 0x573   : > { %1617 = vadd.xlane.f32.xlu1 %v1616_v48 }
 0x600   : > { %v1618_v52 = vpop.xlane.xlu1 %1617 }
 0x601   : > { %2481 = vrcp.f32 %v1618_v52 }
 0x60b   : > { %v2482_v55 = vpop.eup %2481 }
 0x60c   : > { %v1620_v57 = vmul.f32 %v2482_v55, %v2480_v47 }
 0x60e   : > { %v1621_v58 = vpack.c.bf16 %v1620_v57, %v1620_v57 }
 0x610   : > { %2371 = vmatmul.mubr.msk.bf16.vlgmr.msra.gmra.mrb[36].mxu1 %vm1257_vm2, %v1621_v58 }
 0x611   : > { %2381 = vmatpush3.bf16.xpose.msra.mxu1 %v1722_v61  ;;  %2382 = vmatprep.mubr.msk.bf16.mxu1 %vm2584_vm0, %v2583_v1 }
 0x612   : > { %2392 = vmatprep.subr.bf16.mxu1 %v2583_v1 }
 0x618   : > { %2383 = vmatmul.mubr.msk.bf16.vlgmr.msra.gmra.mrb[40].mxu1 %vm1257_vm2, %v1124_v14 }
 0x619   : > { %2394 = vmatprep.mubr.msk.bf16.mxu1 %vm2584_vm0, %v2583_v1 }
 0x6e3   : > { %v1662_v4 = vpop.f32.mrb[36].mxu1 }
 0x6e4   : > { %v1668_v6 = vpack.c.bf16 %v1662_v4, %v1662_v4  ;;  %v2372_v7 = vpop.f32.mrb[37].mxu1 }
 0x6e5   : > { %v1665_v8 = vpop.f32.mrb[38].mxu1 }
 0x6e6   : > { %v2373_v9 = vpop.f32.mrb[39].mxu1  ;;  %2377 = vmatmul.mubr.msk.bf16.vlgmr.msra.gmra.mrb[40].mxu0 %vm1257_vm2, %v1668_v6 }
 0x6e7   : > { %2387 = vmatpush3.bf16.msra.mxu0 %v1780_v46  ;;  %2388 = vmatprep.mubr.msk.bf16.mxu0 %vm2584_vm0, %v2583_v1 }
 0x6eb   : > { %v1758_v11 = vpop.f32.mrb[40].mxu1 }
 0x6ec   : > { %v2384_v12 = vpop.f32.mrb[41].mxu1  ;;  %v1764_v13 = vsel %vm1257_vm2, %v1758_v11, -inf }
 0x6ed   : > { %1765 = vmax.xlane.f32.xlu0 %v1764_v13  ;;  %v1761_v50 = vpop.f32.mrb[42].mxu1 }
 0x6ee   : > { %v2385_v15 = vpop.f32.mrb[43].mxu1 }
 0x703   : > { %1882 = vrot.lane.b32.xlu0 %v2926_v2, %s2585_s16  ;;  %v2161_v2 = vld [vmem:[%s3108_s9 + $0xc] sm:$0xf] }
 0x704   : > { %v1829_v25 = vsel %vm1319_vm3, %v2161_v2, 0 }
 0x705   : > { %2393 = vmatpush3.bf16.msra.mxu1 %v1829_v25 }
 0x77a   : > { %v1766_v16 = vpop.xlane.xlu0 %1765 }
 0x77b   : > { %v1767_v17 = vsub.f32 %v1758_v11, %v1766_v16 }
 0x77d   : > { %v1768_v18 = vmul.f32 1.442695, %v1767_v17 }
 0x77e   : > { %v1883_v29 = vpop.permute.xlu0 %1882 }
 0x77f   : > { %2483 = vpow2.f32 %v1768_v18  ;;  %v1893_v31 = vsel %vm1257_vm2, %v2914_v59, %v1883_v29 }
 0x789   : > { %v2484_v10 = vpop.eup %2483 }
 0x78a   : > { %v1770_v19 = vsel %vm1257_vm2, %v2484_v10, 0.0 }
 0x78b   : > { %1771 = vadd.xlane.f32.xlu1 %v1770_v19 }
 0x79c   : > { %1886 = vrot.lane.b32.xlu1 %v1620_v57, %s2586_s17  ;;  %s3024_s17 = scalar_lea.hbm %s3111_s12, %s3113_s28 }
 0x7b9   : > { %v1711_v1 = vpop.f32.mrb[40].mxu0 }
 0x7ba   : > { %v3001_v20 = vadd.f32 %v1711_v1, %v2964_v35  ;;  %v2378_v21 = vpop.f32.mrb[41].mxu0 }
 0x7bb   : > { %v1714_v22 = vpop.f32.mrb[42].mxu0 }
 0x7bc   : > { %v2379_v23 = vpop.f32.mrb[43].mxu0 }
 0x818   : > { %v1772_v24 = vpop.xlane.xlu1 %1771 }
 0x819   : > { %2485 = vrcp.f32 %v1772_v24 }
 0x81c   : > { %v1887_v30 = vpop.permute.xlu1 %1886 }
 0x81d   : > { %v1895_v32 = vsel %vm1894_vm4, %v1893_v31, %v1887_v30 }
 0x823   : > { %v2486_v26 = vpop.eup %2485 }
 0x824   : > { %v1774_v27 = vmul.f32 %v2486_v26, %v2484_v10 }
 0x826   : > { %1890 = vrot.lane.b32.xlu1 %v1774_v27, %s2587_s30  ;;  %v1775_v28 = vpack.c.bf16 %v1774_v27, %v1774_v27  ;;  %s2487_s30 = scalar_lea.vmem %s1932_s19, 128 }
 0x827   : > { %p2488_p11 = scmp.ne.s32.totalorder %s1932_s19, %s2487_s30  ;;  %p2495_p1 = scmp.lt.s32.totalorder %s2493_s1, %s2487_s30 }
 0x828   : > { %2389 = vmatmul.mubr.msk.bf16.vlgmr.msra.gmra.mrb[44].mxu0 %vm1257_vm2, %v1775_v28 }
 0x829   : > { %p2489_p12 = pnand %p2488_p11, %p2693_p5  ;;  %p2496_p2 = por %p2495_p1, %p2494_p0 }
 0x82b   : > { %p2490_p13 = pneg %p2489_p12 }
 0x82d   : > { %p2497_p3 = pnand %p2496_p2, %p2490_p13 }
 0x898   : > { %v1891_v33 = vpop.permute.xlu1 %1890 }
 0x899   : > { %v1897_v34 = vsel %vm1896_vm5, %v1895_v32, %v1891_v33 }
 0x89a   : > { %1898 = vst.msk [vmem:[%s441_s26] sm:$0xff] %vm484_vm1, %v1897_v34 }
 0x8fb   : > { %v1816_v35 = vpop.f32.mrb[44].mxu0 }
 0x8fc   : > { %v1822_v36 = vpack.c.bf16 %v1816_v35, %v1816_v35  ;;  %v2390_v37 = vpop.f32.mrb[45].mxu0 }
 0x8fd   : > { %v1819_v38 = vpop.f32.mrb[46].mxu0 }
 0x8fe   : > { %v2391_v39 = vpop.f32.mrb[47].mxu0  ;;  %2395 = vmatmul.mubr.msk.bf16.vlgmr.msra.gmra.mrb[44].mxu1 %vm1257_vm2, %v1822_v36 }
 0x8ff   : > { %2500 = shalt.err (!%p2497_p3)
}
 0x900   : > { %s2501_s26 = scalar_lea.hbm %s3024_s17, 128  ;;  %s2505_s15 = scalar_lea.hbm %s3111_s12, 256 }
 0x901   : > { %p2502_p4 = scmp.ne.s32.totalorder %s3024_s17, %s2501_s26  ;;  %p2506_p9 = scmp.lt.u32.totalorder %s3024_s17, %s3111_s12 }
 0x902   : > { %p2507_p10 = scmp.lt.u32.totalorder %s2505_s15, %s2501_s26  ;;  %p2509_p12 = scmp.lt.u32.totalorder %s2501_s26, %s3024_s17 }
 0x903   : > { %p2503_p7 = pnand %p2502_p4, %p2693_p5 }
 0x904   : > { %p2508_p11 = por %p2507_p10, %p2506_p9 }
 0x905   : > { %p2504_p8 = pneg %p2503_p7 }
 0x906   : > { %p2510_p13 = por %p2509_p12, %p2508_p11 }
 0x908   : > { %p2511_p0 = pnand %p2510_p13, %p2504_p8 }
 0x90a   : > { %2514 = shalt.err (!%p2511_p0)
}
 0x90b   : > { %2399 = dma.vmem_to_hbm [thread:$0]  (%p2693_p5), %s1932_s19, 128, %s3024_s17, %s1905_s20   ;;  %v2163_v5 = vld [vmem:[%s3109_s10] ss:$0 sm:$0xff] }
 0x90c   : > { %s3121_s28 = sshll.u32 %s3009_s18, 3  ;;  %s3122_s26 = sshll.u32 %s2676_s25, 7 }
 0x90d   : > { %s434_s29 = scalar_lea.vmem [#allocation2], %s3121_s28  ;;  %s3055_s17 = scalar_lea.hbm %s3110_s11, %s3122_s26 }
 0x90e   : > { %s1918_s16 = sshll.u32 %s434_s29, 4  ;;  %s1900_s19 = scalar_lea.sflag [#allocation3], %s3009_s18  ;;  %s3057_s16 = int_to_ptr.vmem [resolvable:$true] %s1918_s16 }
 0x90f   : > { %s2515_s20 = scalar_lea.vmem %s3057_s16, 128  ;;  %s2589_s1 = smov [#allocation2]  }
 0x910   : > { %p2516_p1 = scmp.ne.s32.totalorder %s3057_s16, %s2515_s20  ;;  %s2519_s25 = sshll.u32 %s2589_s1, 4  ;;  %s2520_s25 = int_to_ptr.vmem [resolvable:$false] %s2519_s25 }
 0x911   : > { %s2521_s30 = scalar_lea.vmem %s2520_s25, 256  ;;  %p2522_p4 = scmp.lt.s32.totalorder %s3057_s16, %s2520_s25 }
 0x912   : > { %p2517_p2 = pnand %p2516_p1, %p2693_p5  ;;  %p2523_p7 = scmp.lt.s32.totalorder %s2521_s30, %s2515_s20 }
 0x914   : > { %p2518_p3 = pneg %p2517_p2  ;;  %p2524_p8 = por %p2523_p7, %p2522_p4 }
 0x916   : > { %p2525_p9 = pnand %p2524_p8, %p2518_p3 }
 0x9d1   : > { %v1865_v59 = vpop.f32.mrb[44].mxu1 }
 0x9d2   : > { %v1871_v40 = vadd.f32 %v1865_v59, %v3001_v20  ;;  %v2396_v41 = vpop.f32.mrb[45].mxu1 }
 0x9d3   : > { %v1868_v42 = vpop.f32.mrb[46].mxu1 }
 0x9d4   : > { %v1879_v43 = vadd.f32 %v2163_v5, %v1871_v40  ;;  %v2397_v44 = vpop.f32.mrb[47].mxu1 }
 0x9d6   : > { %1880 = vst.msk [vmem:[%s434_s29] sm:$0xff] %vm484_vm1, %v1879_v43 }
 0x9d7   : > { %2528 = shalt.err (!%p2525_p9)
}
 0x9d8   : > { %s2529_s18 = scalar_lea.hbm %s3055_s17, 128  ;;  %s2533_s26 = scalar_lea.hbm %s3110_s11, 256 }
 0x9d9   : > { %p2530_p10 = scmp.ne.s32.totalorder %s3055_s17, %s2529_s18  ;;  %p2534_p13 = scmp.lt.u32.totalorder %s3055_s17, %s3110_s11 }
 0x9da   : > { %p2535_p0 = scmp.lt.u32.totalorder %s2533_s26, %s2529_s18  ;;  %p2537_p2 = scmp.lt.u32.totalorder %s2529_s18, %s3055_s17 }
 0x9db   : > { %p2531_p11 = pnand %p2530_p10, %p2693_p5 }
 0x9dc   : > { %p2536_p1 = por %p2535_p0, %p2534_p13 }
 0x9dd   : > { %p2532_p12 = pneg %p2531_p11 }
 0x9de   : > { %p2538_p3 = por %p2537_p2, %p2536_p1 }
 0x9e0   : > { %p2539_p4 = pnand %p2538_p3, %p2532_p12 }
 0x9e2   : > { %2542 = shalt.err (!%p2539_p4)
}
 0x9e3   : > { %2398 = dma.vmem_to_hbm [thread:$0]  (%p2693_p5), %s3057_s16, 128, %s3055_s17, %s1900_s19  }
 0x9e4 PF: > { %p2409_p7 = scmp.ge.s32.totalorder %s2581_s24, 2  ;;  %s1943_s20 = sand.u32 1, %s2569_s21  }
 0x9e5   : > { %s1944_s1 = scalar_lea.sflag [#allocation3], %s1943_s20 }
 0x9e6   : > { %p2403_p8 = pnand %p2409_p7, %p2697_p6 }
 0x9e8   : > { %2560 = dma.done.wait (!%p2403_p8), %s1944_s1, 128  }
 0x9e9   : > { %2562 = vsyncadd (!%p2403_p8), %s1944_s1, 4294967168  ;;  %s1953_s25 = scalar_lea.sflag [#allocation5], %s1943_s20 }
 0x9ea   : > { %2564 = dma.done.wait (!%p2403_p8), %s1953_s25, 128  }
 0x9eb   : > { %2566 = vsyncadd (!%p2403_p8), %s1953_s25, 4294967168  ;;  %s3123_s13 = sld [smem:[#allocation8_spill]]  ;;  %p26_p5 = scmp.ge.s32.totalorder %s2680_s27, 4  }
 0x9ec   : > { %s3124_s21 = smov %s2573_s22  ;;  %s3125_s22 = smov %s2577_s23 }
 0x9ed   : > { %s3127_s24 = smov %s2680_s27  ;;  %28 = sbr.rel (!%p26_p5) target bundleno = 8 (0x8), region = 143 }
 0x9f1   : > { %s3126_s23 = smov %s3123_s13 }
 0x9f4   :  { %1958 = vsyncpa [#allocation3], 1 }
 0x9f5   :  { %1960 = vsyncpa [#allocation3 + $0x1], 1 }
 0x9f6   :  { %1961 = vsyncpa [#allocation5], 1 }
 0x9f7   :  { %1963 = vsyncpa [#allocation5 + $0x1], 1 }

</bundles_post_ra>
